<compile_context>
chip_gen: v7x
topology: tpu7x:2x2x1
jax: 0.10.0
libtpu: 0.0.40
codegen_flags: <defaults>
</compile_context>

<pallas_src>
import functools

import jax
import jax.numpy as jnp
from jax.experimental import pallas as pl
from jax.experimental.pallas import tpu as pltpu

KH = KW = 3      # kernel_size = 3
PAD = 1          # 'same' padding for stride=1, dilation=1
LANES = 128      # TPU lane width
SUBLANES = 8     # TPU sublane width (f32)


def _round_up(x, m):
    return (x + m - 1) // m * m


def _vmem_budget_and_limit():
    """Generation-aware VMEM sizing (v7x: 64 MiB/TC, v5e/v6e: 128 MiB)."""
    cap = 64 * 1024 * 1024                      # conservative fallback (v7x-sized)
    try:
        cap = int(pltpu.get_tpu_info().vmem_capacity_bytes)
    except Exception:
        pass
    budget = int(cap * 0.45)                    # tile-chooser working-set budget
    limit = min(int(cap * 0.75), 112 * 1024 * 1024)
    return budget, limit


def _choose_tile_h(N, H, Wp, Wc, Cp, Coutp, in_sz, vpu_sz, mxu_sz, out_sz, budget):
    """Largest row tile TH dividing H that fits the budget, preferring >= 4
    total grid steps so both TensorCores get a balanced split."""

    def need(th):
        halo = 2 * 2 * 2 * Wp * Cp * in_sz                 # 2 halo rows, double-buffered
        mid = 2 * th * Wp * Cp * in_sz                      # center tile, double-buffered
        out = 2 * th * Wc * Coutp * out_sz                  # output tile, double-buffered
        wts = 2 * (KH * KW * Cp * vpu_sz + Cp * Coutp * mxu_sz)
        slabs = 3 * (th + 2) * Wc * Cp * vpu_sz             # column-shifted slabs (worst case)
        acc = th * Wc * Cp * vpu_sz                         # depthwise accumulator
        lhs = th * Wc * Cp * mxu_sz                         # matmul lhs copy
        res = th * Wc * Coutp * 4                           # f32 matmul result
        return halo + mid + out + wts + slabs + acc + lhs + res

    divisors = [d for d in range(H, 0, -1) if H % d == 0]
    fitting = [d for d in divisors if need(d) <= budget]
    if not fitting:
        return 1
    for want in (4, 2):                                     # megacore balance, then pipeline overlap
        for d in fitting:                                    # descending: biggest tile that still splits
            if N * (H // d) >= want:
                return d
    return fitting[0]
    # TODO(synk): allow a ragged last row-tile (pl.when-guarded) instead of
    # requiring TH | H, so awkward H doesn't collapse to TH == 1.


def sepconv_kernel(top_ref, mid_ref, bot_ref, dw_ref, pw_ref, o_ref):
    """Fused depthwise(3x3) + pointwise(1x1) conv for one (batch, row-tile).

    top_ref: (1, 1, Wp, Cp)   row i*th - 1 of the padded input (clamped at top)
    mid_ref: (1, th, Wp, Cp)  rows i*th .. i*th+th-1
    bot_ref: (1, 1, Wp, Cp)   row i*th + th (bottom zero-pad row for last tile)
    dw_ref : (KH, KW, Cp)     depthwise filter (one 3x3 filter per channel)
    pw_ref : (Cp, Coutp)      pointwise (1x1) filter
    o_ref  : (1, th, Wc, Coutp)
    """
    i = pl.program_id(1)
    th = o_ref.shape[1]
    wc = o_ref.shape[2]
    vdt = dw_ref.dtype

    # Top halo: the clamped DMA fetched row 0 when i == 0; the real 'same'
    # padding row there is all zeros, so scale it out with a scalar select.
    top_row = top_ref[0, 0]
    top = top_row * (i > 0).astype(top_row.dtype)            # (Wp, Cp)

    dw = dw_ref[...]                                          # (3, 3, Cp), tiny, resident

    # Depthwise conv: one column(W)-shifted slab per kw (the only shift that
    # costs a sublane relayout); the 3 row taps reuse it via free leading-axis
    # slices.  All 9 tap terms are fused into a single expression whose first
    # term is the initializer -- no zeros init, no accumulator store/reload.
    acc = None
    for kw in range(KW):
        slab = jnp.concatenate(
            [top[None, kw:kw + wc, :],
             mid_ref[0, :, kw:kw + wc, :],
             bot_ref[0, :, kw:kw + wc, :]], axis=0).astype(vdt)   # (th+2, wc, Cp)
        part = (slab[0:th] * dw[0, kw]
                + slab[1:th + 1] * dw[1, kw]
                + slab[2:th + 2] * dw[2, kw])
        acc = part if acc is None else acc + part

    # Pointwise 1x1 conv == (th*wc, Cp) @ (Cp, Coutp) on the MXU.  wc % 8 == 0
    # and Cp/Coutp are multiples of 128, so both reshapes are pure relabels and
    # the output store is lane-dense (unmasked vst).
    lhs = acc.reshape(th * wc, acc.shape[-1]).astype(pw_ref.dtype)
    out = jnp.dot(lhs, pw_ref[...], preferred_element_type=jnp.float32)
    o_ref[...] = out.reshape(1, th, wc, -1).astype(o_ref.dtype)


@functools.partial(jax.jit, static_argnames=("mxu_bf16",))
def separable_conv2d(x_nchw, dw_torch, pw_torch, *, mxu_bf16=False):
    """x_nchw: (N, C, H, W); dw_torch: (C, 1, 3, 3); pw_torch: (Cout, C, 1, 1).

    mxu_bf16=True runs the pointwise matmul in bf16 (f32 accumulation) even for
    f32 models -- ~3x MXU throughput on v6e/v7x at a small accuracy cost.
    """
    N, C, H, W = x_nchw.shape
    Cout = pw_torch.shape[0]

    Cp = _round_up(C, LANES)
    Coutp = _round_up(Cout, LANES)
    Wc = _round_up(W, SUBLANES)          # compute width: keeps reshapes relayout-free
    Wp = Wc + 2 * PAD

    is_bf16 = x_nchw.dtype == jnp.bfloat16
    vdt = jnp.bfloat16 if is_bf16 else jnp.float32           # depthwise VALU dtype
    mxu_dt = jnp.bfloat16 if (is_bf16 or mxu_bf16) else jnp.float32

    budget, vmem_limit = _vmem_budget_and_limit()
    in_sz = jnp.dtype(x_nchw.dtype).itemsize
    th = _choose_tile_h(N, H, Wp, Wc, Cp, Coutp, in_sz,
                        jnp.dtype(vdt).itemsize, jnp.dtype(mxu_dt).itemsize,
                        in_sz, budget)
    n_th = H // th

    # NCHW -> NHWC, single layout-prep pass: 1 'same' zero row at the bottom
    # (the top 'same' row is synthesized in-kernel), 1 'same' column each side
    # plus extra right columns up to Wc, channels padded to the lane width.
    # There is no separate halo-gather pass anymore.
    # TODO(synk): when chaining SeparableConv2d layers, keep activations in
    # padded NHWC between layers and skip this transpose/pad plus the final
    # slice/transpose (only convert at network boundaries).
    # TODO(synk): for C << 128 the lane padding still inflates depthwise work
    # and input DMA ~ (128/C)x; a W-on-lanes depthwise layout (padding channels
    # only for the pointwise matmul) would remove that but needs a different
    # tiling.
    x = jnp.transpose(x_nchw, (0, 2, 3, 1))
    x = jnp.pad(x, ((0, 0), (0, PAD), (PAD, PAD + Wc - W), (0, Cp - C)))
    # x: (N, H + 1, Wp, Cp); row H and columns {0, W+1 .. Wp-1} are zeros.

    dw = jnp.transpose(dw_torch[:, 0, :, :], (1, 2, 0))       # (KH, KW, C)
    dw = jnp.pad(dw, ((0, 0), (0, 0), (0, Cp - C))).astype(vdt)
    pw = jnp.transpose(pw_torch[:, :, 0, 0], (1, 0))          # (C, Cout)
    pw = jnp.pad(pw, ((0, Cp - C), (0, Coutp - Cout))).astype(mxu_dt)

    out_nhwc = pl.pallas_call(
        sepconv_kernel,
        out_shape=jax.ShapeDtypeStruct((N, H, Wc, Coutp), x_nchw.dtype),
        grid_spec=pltpu.PrefetchScalarGridSpec(
            num_scalar_prefetch=0,
            grid=(N, n_th),
            in_specs=[
                # 1-row top halo: row i*th - 1 (clamped; zeroed in-kernel at i==0).
                pl.BlockSpec((1, 1, Wp, Cp),
                             lambda n, i: (n, jnp.maximum(i * th - 1, 0), 0, 0)),
                # th-row center block.
                pl.BlockSpec((1, th, Wp, Cp), lambda n, i: (n, i, 0, 0)),
                # 1-row bottom halo: row i*th + th (zero-pad row for the last tile).
                pl.BlockSpec((1, 1, Wp, Cp),
                             lambda n, i: (n, i * th + th, 0, 0)),
                pl.BlockSpec((KH, KW, Cp), lambda n, i: (0, 0, 0)),
                pl.BlockSpec((Cp, Coutp), lambda n, i: (0, 0)),
            ],
            out_specs=pl.BlockSpec((1, th, Wc, Coutp), lambda n, i: (n, i, 0, 0)),
        ),
        compiler_params=pltpu.CompilerParams(
            dimension_semantics=("parallel", "parallel"),
            vmem_limit_bytes=vmem_limit),
    )(x, x, x, dw, pw)

    # Drop the width/channel padding and return PyTorch's NCHW layout
    # (one fused slice + transpose pass).
    return jnp.transpose(out_nhwc[:, :, :W, :Cout], (0, 3, 1, 2))


def _reference(x_nchw, dw_torch, pw_torch):
    """Pure-JAX reference using lax conv (matches PyTorch semantics)."""
    C = x_nchw.shape[1]
    dep = jax.lax.conv_general_dilated(
        x_nchw, dw_torch, window_strides=(1, 1), padding="SAME",
        dimension_numbers=("NCHW", "OIHW", "NCHW"), feature_group_count=C)
    pnt = jax.lax.conv_general_dilated(
        dep, pw_torch, window_strides=(1, 1), padding="VALID",
        dimension_numbers=("NCHW", "OIHW", "NCHW"))
    return pnt


if __name__ == "__main__":
    N, C, H, W = 2, 4, 16, 16
    Cout = 12

    key = jax.random.PRNGKey(0)
    kx, kd, kp = jax.random.split(key, 3)

    x = jax.random.normal(kx, (N, C, H, W), dtype=jnp.float32)
    # Depthwise weight: (C, 1, KH, KW)  (groups = C, out_channels = C)
    dw_w = jax.random.normal(kd, (C, 1, KH, KW), dtype=jnp.float32) * 0.1
    # Pointwise weight: (Cout, C, 1, 1)
    pw_w = jax.random.normal(kp, (Cout, C, 1, 1), dtype=jnp.float32) * 0.1

    out = separable_conv2d(x, dw_w, pw_w)
    out = jax.block_until_ready(out)

    ref = _reference(x, dw_w, pw_w)
    assert out.shape == (N, Cout, H, W), out.shape
    assert jnp.allclose(out, ref, atol=1e-4, rtol=1e-4), "mismatch vs reference"

    print("KERNEL_OK")
</pallas_src>

<mosaic_0001>
module attributes {stable_mosaic.version = 11 : i64} {
  func.func @sepconv_kernel(%arg0: i32, %arg1: i32, %arg2: memref<1x1x18x128xf32, #tpu.memory_space<vmem>>, %arg3: memref<1x8x18x128xf32, #tpu.memory_space<vmem>>, %arg4: memref<1x1x18x128xf32, #tpu.memory_space<vmem>>, %arg5: memref<3x3x128xf32, #tpu.memory_space<vmem>>, %arg6: memref<128x128xf32, #tpu.memory_space<vmem>>, %arg7: memref<1x8x16x128xf32, #tpu.memory_space<vmem>>) attributes {dimension_semantics = [#tpu.dimension_semantics<parallel>, #tpu.dimension_semantics<parallel>], iteration_bounds = array<i64: 2, 2>, scalar_prefetch = 0 : i64, scratch_operands = 0 : i64, tpu.core_type = #tpu.core_type<tc>, window_params = [{transform_indices = @transform_0, window_bounds = array<i64: 1, 1, 18, 128>}, {transform_indices = @transform_1, window_bounds = array<i64: 1, 8, 18, 128>}, {transform_indices = @transform_2, window_bounds = array<i64: 1, 1, 18, 128>}, {pipeline_mode = #tpu.pipeline_mode<synchronous>, transform_indices = @transform_3, window_bounds = array<i64: 3, 3, 128>}, {pipeline_mode = #tpu.pipeline_mode<synchronous>, transform_indices = @transform_4, window_bounds = array<i64: 128, 128>}, {transform_indices = @transform_5, window_bounds = array<i64: 1, 8, 16, 128>}]} {
    %c0 = arith.constant 0 : index
    %c0_0 = arith.constant 0 : index
    %c0_1 = arith.constant 0 : index
    %c0_2 = arith.constant 0 : index
    %0 = vector.load %arg2[%c0, %c0_0, %c0_1, %c0_2] : memref<1x1x18x128xf32, #tpu.memory_space<vmem>>, vector<1x1x18x128xf32>
    %1 = vector.shape_cast %0 : vector<1x1x18x128xf32> to vector<18x128xf32>
    %c0_i32 = arith.constant 0 : i32
    %2 = arith.cmpi sgt, %arg1, %c0_i32 : i32
    %3 = arith.extui %2 : i1 to i32
    %4 = arith.sitofp %3 : i32 to f32
    %5 = vector.broadcast %4 : f32 to vector<18x128xf32>
    %6 = arith.mulf %1, %5 : vector<18x128xf32>
    %c0_3 = arith.constant 0 : index
    %c0_4 = arith.constant 0 : index
    %c0_5 = arith.constant 0 : index
    %7 = vector.load %arg5[%c0_3, %c0_4, %c0_5] : memref<3x3x128xf32, #tpu.memory_space<vmem>>, vector<3x3x128xf32>
    %8 = vector.extract_strided_slice %6 {offsets = [0, 0], sizes = [16, 128], strides = [1, 1]} : vector<18x128xf32> to vector<16x128xf32>
    %9 = vector.shape_cast %8 : vector<16x128xf32> to vector<1x16x128xf32>
    %c0_6 = arith.constant 0 : index
    %c0_7 = arith.constant 0 : index
    %c0_8 = arith.constant 0 : index
    %c0_9 = arith.constant 0 : index
    %10 = vector.load %arg3[%c0_6, %c0_7, %c0_8, %c0_9] : memref<1x8x18x128xf32, #tpu.memory_space<vmem>>, vector<1x8x16x128xf32>
    %11 = vector.shape_cast %10 : vector<1x8x16x128xf32> to vector<8x16x128xf32>
    %c0_10 = arith.constant 0 : index
    %c0_11 = arith.constant 0 : index
    %c0_12 = arith.constant 0 : index
    %c0_13 = arith.constant 0 : index
    %12 = vector.load %arg4[%c0_10, %c0_11, %c0_12, %c0_13] : memref<1x1x18x128xf32, #tpu.memory_space<vmem>>, vector<1x1x16x128xf32>
    %13 = vector.shape_cast %12 : vector<1x1x16x128xf32> to vector<1x16x128xf32>
    %14 = tpu.concatenate %9, %11, %13 in 0 : vector<1x16x128xf32>, vector<8x16x128xf32>, vector<1x16x128xf32> -> vector<10x16x128xf32>
    %15 = vector.extract_strided_slice %14 {offsets = [0, 0, 0], sizes = [8, 16, 128], strides = [1, 1, 1]} : vector<10x16x128xf32> to vector<8x16x128xf32>
    %16 = vector.extract_strided_slice %7 {offsets = [0, 0, 0], sizes = [1, 1, 128], strides = [1, 1, 1]} : vector<3x3x128xf32> to vector<1x1x128xf32>
    %17 = vector.shape_cast %16 : vector<1x1x128xf32> to vector<128xf32>
    %18 = vector.shape_cast %17 : vector<128xf32> to vector<1x1x128xf32>
    %19 = vector.broadcast %18 : vector<1x1x128xf32> to vector<8x16x128xf32>
    %20 = arith.mulf %15, %19 : vector<8x16x128xf32>
    %21 = vector.extract_strided_slice %14 {offsets = [1, 0, 0], sizes = [8, 16, 128], strides = [1, 1, 1]} : vector<10x16x128xf32> to vector<8x16x128xf32>
    %22 = vector.extract_strided_slice %7 {offsets = [1, 0, 0], sizes = [1, 1, 128], strides = [1, 1, 1]} : vector<3x3x128xf32> to vector<1x1x128xf32>
    %23 = vector.shape_cast %22 : vector<1x1x128xf32> to vector<128xf32>
    %24 = vector.shape_cast %23 : vector<128xf32> to vector<1x1x128xf32>
    %25 = vector.broadcast %24 : vector<1x1x128xf32> to vector<8x16x128xf32>
    %26 = arith.mulf %21, %25 : vector<8x16x128xf32>
    %27 = arith.addf %20, %26 : vector<8x16x128xf32>
    %28 = vector.extract_strided_slice %14 {offsets = [2, 0, 0], sizes = [8, 16, 128], strides = [1, 1, 1]} : vector<10x16x128xf32> to vector<8x16x128xf32>
    %29 = vector.extract_strided_slice %7 {offsets = [2, 0, 0], sizes = [1, 1, 128], strides = [1, 1, 1]} : vector<3x3x128xf32> to vector<1x1x128xf32>
    %30 = vector.shape_cast %29 : vector<1x1x128xf32> to vector<128xf32>
    %31 = vector.shape_cast %30 : vector<128xf32> to vector<1x1x128xf32>
    %32 = vector.broadcast %31 : vector<1x1x128xf32> to vector<8x16x128xf32>
    %33 = arith.mulf %28, %32 : vector<8x16x128xf32>
    %34 = arith.addf %27, %33 : vector<8x16x128xf32>
    %35 = vector.extract_strided_slice %6 {offsets = [1, 0], sizes = [16, 128], strides = [1, 1]} : vector<18x128xf32> to vector<16x128xf32>
    %36 = vector.shape_cast %35 : vector<16x128xf32> to vector<1x16x128xf32>
    %c0_14 = arith.constant 0 : index
    %c0_15 = arith.constant 0 : index
    %c1 = arith.constant 1 : index
    %c0_16 = arith.constant 0 : index
    %37 = vector.load %arg3[%c0_14, %c0_15, %c1, %c0_16] : memref<1x8x18x128xf32, #tpu.memory_space<vmem>>, vector<1x8x16x128xf32>
    %38 = vector.shape_cast %37 : vector<1x8x16x128xf32> to vector<8x16x128xf32>
    %c0_17 = arith.constant 0 : index
    %c0_18 = arith.constant 0 : index
    %c1_19 = arith.constant 1 : index
    %c0_20 = arith.constant 0 : index
    %39 = vector.load %arg4[%c0_17, %c0_18, %c1_19, %c0_20] : memref<1x1x18x128xf32, #tpu.memory_space<vmem>>, vector<1x1x16x128xf32>
    %40 = vector.shape_cast %39 : vector<1x1x16x128xf32> to vector<1x16x128xf32>
    %41 = tpu.concatenate %36, %38, %40 in 0 : vector<1x16x128xf32>, vector<8x16x128xf32>, vector<1x16x128xf32> -> vector<10x16x128xf32>
    %42 = vector.extract_strided_slice %41 {offsets = [0, 0, 0], sizes = [8, 16, 128], strides = [1, 1, 1]} : vector<10x16x128xf32> to vector<8x16x128xf32>
    %43 = vector.extract_strided_slice %7 {offsets = [0, 1, 0], sizes = [1, 1, 128], strides = [1, 1, 1]} : vector<3x3x128xf32> to vector<1x1x128xf32>
    %44 = vector.shape_cast %43 : vector<1x1x128xf32> to vector<128xf32>
    %45 = vector.shape_cast %44 : vector<128xf32> to vector<1x1x128xf32>
    %46 = vector.broadcast %45 : vector<1x1x128xf32> to vector<8x16x128xf32>
    %47 = arith.mulf %42, %46 : vector<8x16x128xf32>
    %48 = vector.extract_strided_slice %41 {offsets = [1, 0, 0], sizes = [8, 16, 128], strides = [1, 1, 1]} : vector<10x16x128xf32> to vector<8x16x128xf32>
    %49 = vector.extract_strided_slice %7 {offsets = [1, 1, 0], sizes = [1, 1, 128], strides = [1, 1, 1]} : vector<3x3x128xf32> to vector<1x1x128xf32>
    %50 = vector.shape_cast %49 : vector<1x1x128xf32> to vector<128xf32>
    %51 = vector.shape_cast %50 : vector<128xf32> to vector<1x1x128xf32>
    %52 = vector.broadcast %51 : vector<1x1x128xf32> to vector<8x16x128xf32>
    %53 = arith.mulf %48, %52 : vector<8x16x128xf32>
    %54 = arith.addf %47, %53 : vector<8x16x128xf32>
    %55 = vector.extract_strided_slice %41 {offsets = [2, 0, 0], sizes = [8, 16, 128], strides = [1, 1, 1]} : vector<10x16x128xf32> to vector<8x16x128xf32>
    %56 = vector.extract_strided_slice %7 {offsets = [2, 1, 0], sizes = [1, 1, 128], strides = [1, 1, 1]} : vector<3x3x128xf32> to vector<1x1x128xf32>
    %57 = vector.shape_cast %56 : vector<1x1x128xf32> to vector<128xf32>
    %58 = vector.shape_cast %57 : vector<128xf32> to vector<1x1x128xf32>
    %59 = vector.broadcast %58 : vector<1x1x128xf32> to vector<8x16x128xf32>
    %60 = arith.mulf %55, %59 : vector<8x16x128xf32>
    %61 = arith.addf %54, %60 : vector<8x16x128xf32>
    %62 = arith.addf %34, %61 : vector<8x16x128xf32>
    %63 = vector.extract_strided_slice %6 {offsets = [2, 0], sizes = [16, 128], strides = [1, 1]} : vector<18x128xf32> to vector<16x128xf32>
    %64 = vector.shape_cast %63 : vector<16x128xf32> to vector<1x16x128xf32>
    %c0_21 = arith.constant 0 : index
    %c0_22 = arith.constant 0 : index
    %c2 = arith.constant 2 : index
    %c0_23 = arith.constant 0 : index
    %65 = vector.load %arg3[%c0_21, %c0_22, %c2, %c0_23] : memref<1x8x18x128xf32, #tpu.memory_space<vmem>>, vector<1x8x16x128xf32>
    %66 = vector.shape_cast %65 : vector<1x8x16x128xf32> to vector<8x16x128xf32>
    %c0_24 = arith.constant 0 : index
    %c0_25 = arith.constant 0 : index
    %c2_26 = arith.constant 2 : index
    %c0_27 = arith.constant 0 : index
    %67 = vector.load %arg4[%c0_24, %c0_25, %c2_26, %c0_27] : memref<1x1x18x128xf32, #tpu.memory_space<vmem>>, vector<1x1x16x128xf32>
    %68 = vector.shape_cast %67 : vector<1x1x16x128xf32> to vector<1x16x128xf32>
    %69 = tpu.concatenate %64, %66, %68 in 0 : vector<1x16x128xf32>, vector<8x16x128xf32>, vector<1x16x128xf32> -> vector<10x16x128xf32>
    %70 = vector.extract_strided_slice %69 {offsets = [0, 0, 0], sizes = [8, 16, 128], strides = [1, 1, 1]} : vector<10x16x128xf32> to vector<8x16x128xf32>
    %71 = vector.extract_strided_slice %7 {offsets = [0, 2, 0], sizes = [1, 1, 128], strides = [1, 1, 1]} : vector<3x3x128xf32> to vector<1x1x128xf32>
    %72 = vector.shape_cast %71 : vector<1x1x128xf32> to vector<128xf32>
    %73 = vector.shape_cast %72 : vector<128xf32> to vector<1x1x128xf32>
    %74 = vector.broadcast %73 : vector<1x1x128xf32> to vector<8x16x128xf32>
    %75 = arith.mulf %70, %74 : vector<8x16x128xf32>
    %76 = vector.extract_strided_slice %69 {offsets = [1, 0, 0], sizes = [8, 16, 128], strides = [1, 1, 1]} : vector<10x16x128xf32> to vector<8x16x128xf32>
    %77 = vector.extract_strided_slice %7 {offsets = [1, 2, 0], sizes = [1, 1, 128], strides = [1, 1, 1]} : vector<3x3x128xf32> to vector<1x1x128xf32>
    %78 = vector.shape_cast %77 : vector<1x1x128xf32> to vector<128xf32>
    %79 = vector.shape_cast %78 : vector<128xf32> to vector<1x1x128xf32>
    %80 = vector.broadcast %79 : vector<1x1x128xf32> to vector<8x16x128xf32>
    %81 = arith.mulf %76, %80 : vector<8x16x128xf32>
    %82 = arith.addf %75, %81 : vector<8x16x128xf32>
    %83 = vector.extract_strided_slice %69 {offsets = [2, 0, 0], sizes = [8, 16, 128], strides = [1, 1, 1]} : vector<10x16x128xf32> to vector<8x16x128xf32>
    %84 = vector.extract_strided_slice %7 {offsets = [2, 2, 0], sizes = [1, 1, 128], strides = [1, 1, 1]} : vector<3x3x128xf32> to vector<1x1x128xf32>
    %85 = vector.shape_cast %84 : vector<1x1x128xf32> to vector<128xf32>
    %86 = vector.shape_cast %85 : vector<128xf32> to vector<1x1x128xf32>
    %87 = vector.broadcast %86 : vector<1x1x128xf32> to vector<8x16x128xf32>
    %88 = arith.mulf %83, %87 : vector<8x16x128xf32>
    %89 = arith.addf %82, %88 : vector<8x16x128xf32>
    %90 = arith.addf %62, %89 : vector<8x16x128xf32>
    %91 = vector.shape_cast %90 : vector<8x16x128xf32> to vector<128x128xf32>
    %c0_28 = arith.constant 0 : index
    %c0_29 = arith.constant 0 : index
    %92 = vector.load %arg6[%c0_28, %c0_29] : memref<128x128xf32, #tpu.memory_space<vmem>>, vector<128x128xf32>
    %cst = arith.constant dense<0.000000e+00> : vector<128x128xf32>
    %93 = tpu.matmul %91, %92, %cst {dimension_numbers = #tpu.dot_dimension_numbers<[1], [0], [0], [1], [0, 0, 1, 1], [], []>} : vector<128x128xf32>, vector<128x128xf32>, vector<128x128xf32> -> vector<128x128xf32>
    %94 = vector.shape_cast %93 : vector<128x128xf32> to vector<1x8x16x128xf32>
    %c0_30 = arith.constant 0 : index
    %c0_31 = arith.constant 0 : index
    %c0_32 = arith.constant 0 : index
    %c0_33 = arith.constant 0 : index
    %95 = vector.load %arg7[%c0_30, %c0_31, %c0_32, %c0_33] : memref<1x8x16x128xf32, #tpu.memory_space<vmem>>, vector<1x8x16x128xf32>
    tpu.vector_store %arg7[%c0_30, %c0_31, %c0_32, %c0_33], %94 {strides = array<i32>} : memref<1x8x16x128xf32, #tpu.memory_space<vmem>>, vector<1x8x16x128xf32>,
    return
  }
  func.func @transform_0(%arg0: i32, %arg1: i32) -> (i32, i32, i32, i32) {
    %c8_i32 = arith.constant 8 : i32
    %0 = arith.muli %arg1, %c8_i32 : i32
    %c1_i32 = arith.constant 1 : i32
    %1 = arith.subi %0, %c1_i32 : i32
    %c0_i32 = arith.constant 0 : i32
    %2 = arith.maxsi %1, %c0_i32 : i32
    %c0_i32_0 = arith.constant 0 : i32
    %c0_i32_1 = arith.constant 0 : i32
    %c0_i32_2 = arith.constant 0 : i32
    return %arg0, %2, %c0_i32_0, %c0_i32_1 : i32, i32, i32, i32
  }
  func.func @transform_1(%arg0: i32, %arg1: i32) -> (i32, i32, i32, i32) {
    %c0_i32 = arith.constant 0 : i32
    %c0_i32_0 = arith.constant 0 : i32
    %c0_i32_1 = arith.constant 0 : i32
    return %arg0, %arg1, %c0_i32, %c0_i32_0 : i32, i32, i32, i32
  }
  func.func @transform_2(%arg0: i32, %arg1: i32) -> (i32, i32, i32, i32) {
    %c8_i32 = arith.constant 8 : i32
    %0 = arith.muli %arg1, %c8_i32 : i32
    %c8_i32_0 = arith.constant 8 : i32
    %1 = arith.addi %0, %c8_i32_0 : i32
    %c0_i32 = arith.constant 0 : i32
    %c0_i32_1 = arith.constant 0 : i32
    %c0_i32_2 = arith.constant 0 : i32
    return %arg0, %1, %c0_i32, %c0_i32_1 : i32, i32, i32, i32
  }
  func.func @transform_3(%arg0: i32, %arg1: i32) -> (i32, i32, i32) {
    %c0_i32 = arith.constant 0 : i32
    %c0_i32_0 = arith.constant 0 : i32
    %c0_i32_1 = arith.constant 0 : i32
    %c0_i32_2 = arith.constant 0 : i32
    return %c0_i32, %c0_i32_0, %c0_i32_1 : i32, i32, i32
  }
  func.func @transform_4(%arg0: i32, %arg1: i32) -> (i32, i32) {
    %c0_i32 = arith.constant 0 : i32
    %c0_i32_0 = arith.constant 0 : i32
    %c0_i32_1 = arith.constant 0 : i32
    return %c0_i32, %c0_i32_0 : i32, i32
  }
  func.func @transform_5(%arg0: i32, %arg1: i32) -> (i32, i32, i32, i32) {
    %c0_i32 = arith.constant 0 : i32
    %c0_i32_0 = arith.constant 0 : i32
    %c0_i32_1 = arith.constant 0 : i32
    return %arg0, %arg1, %c0_i32, %c0_i32_0 : i32, i32, i32, i32
  }
}

</mosaic_0001>

<bundles_post_ra>
// kernel: separable_conv2d.1
= control target key start
LH: loop header
LB: loop body
LE: loop exit
PB: predicated region body
PF: predicated region fallthrough
CT: control target
= control target key end

     0   :  { %s1766_s18 = smov 0   ;;  %s1768_s19 = smov 0   ;;  %s2739_s0 = inlined_call_operand.vmem [shape: f32[2,17,18,128], index: 0, kind: input, shape index: {}, may-alias: {0,1,2}]   ;;  %s2740_s1 = inlined_call_operand.vmem [shape: f32[2,17,18,128], index: 1, kind: input, shape index: {}, may-alias: {0,1,2}]   ;;  %s2741_s2 = inlined_call_operand.vmem [shape: f32[2,17,18,128], index: 2, kind: input, shape index: {}, may-alias: {0,1,2}]   ;;  %s2742_s3 = inlined_call_operand.vmem [shape: f32[3,3,128], index: 3, kind: input, shape index: {}]   ;;  %s2743_s4 = inlined_call_operand.vmem [shape: f32[128,128], index: 4, kind: input, shape index: {}]   ;;  %s2744_s5 = inlined_call_operand.vmem [shape: f32[2,16,16,128], index: 5, kind: output, shape index: {}]  }
   0x1   :  { %s1770_s20 = smov 0   ;;  %s1772_s21 = smov 0  }
   0x2   :  { %s1774_s22 = smov 0  }
   0x3 LB: > { %s24_s23 = sadd.s32 1, %s1726_s20  ;;  %s27_s24 = sadd.s32 1, %s1730_s21  ;;  %s1734_s22 = sphi %s1774_s22, %s15_s22   ;;  %s1730_s21 = sphi %s1772_s21, %s2867_s21   ;;  %s1726_s20 = sphi %s1770_s20, %s2866_s20   ;;  %s1722_s19 = sphi %s1768_s19, %s2865_s19   ;;  %s1718_s18 = sphi %s1766_s18, %s2864_s18  }
   0x4   : > { %p25_p0 = scmp.ge.s32.totalorder %s24_s23, 2  ;;  %p1495_p1 = scmp.ge.s32.totalorder %s1734_s22, 1 }
   0x5   : > { %p275_p2 = scmp.lt.s32.totalorder %s1734_s22, 5 }
   0x6   : > { %s2869_s23 = smov (%p25_p0, %s24_s23), 0  ;;  %s2871_s24 = smov (!%p25_p0, %s27_s24), %s1730_s21 }
   0x7   : > { %p276_p3 = pnand %p1495_p1, %p275_p2  ;;  %p29_p4 = scmp.ge.s32.totalorder %s2871_s24, 2 }
   0x9   : > { %s2873_s24 = smov (%p29_p4, %s2871_s24), 0  ;;  %279 = sbr.rel (%p276_p3) target bundleno = 377 (0x179), region = 40 }
  0x10   : > { %v1167_v0 = vld [vmem:[%s2743_s4] sm:$0xff]  ;;  %v1168_v1 = vld [vmem:[%s2743_s4 + $0x8] sm:$0xff]  ;;  %v1169_v2 = vld [vmem:[%s2743_s4 + $0x10] sm:$0xff]  ;;  %s1810_s6 = sshll.u32 %s1718_s18, 3  ;;  %p346_p5 = scmp.lt.s32.totalorder %s1722_s19, 1  ;;  %v435_v5 = vlaneseq  ;;  %vm561_vm0 = vcmask 1040384  }
  0x11   : > { %v1604_v3 = vpack.c.bf16 %v1168_v1, %v1167_v0  ;;  %v1170_v4 = vld [vmem:[%s2743_s4 + $0x18] sm:$0xff]  ;;  %s1497_s9 = sadd.s32 4294967295, %s1810_s6  ;;  %p367_p6 = scmp.lt.s32.totalorder %s1810_s6, 16  ;;  %v1171_v7 = vld [vmem:[%s2743_s4 + $0x20] sm:$0xff]  ;;  %v1172_v8 = vld [vmem:[%s2743_s4 + $0x28] sm:$0xff]  ;;  %vm881_vm1 = vcmask 1041408  }
  0x12   : > { %v1608_v6 = vpack.c.bf16 %v1170_v4, %v1169_v2  ;;  %p344_p7 = scmp.gt.s32.totalorder %s1497_s9, 0  ;;  %p1498_p8 = scmp.lt.s32.totalorder %s1497_s9, 16  ;;  %v1612_v9 = vpack.c.bf16 %v1172_v8, %v1171_v7  ;;  %v436_v10 = vshrl.u32 %v435_v5, 7  ;;  %v1173_v11 = vld [vmem:[%s2743_s4 + $0x30] sm:$0xff]  ;;  %v1174_v12 = vld [vmem:[%s2743_s4 + $0x38] sm:$0xff]  ;;  %v1175_v13 = vld [vmem:[%s2743_s4 + $0x40] sm:$0xff] }
  0x13   : > { %1605 = vmatprep.subr.bf16.mxu0 %v1604_v3  ;;  %1636 = vmatprep.subr.bf16.mxu1 %v1604_v3  ;;  %s2875_s19 = smov (!%p346_p5, %s1722_s19), 1  ;;  %p396_p9 = scmp.lt.s32.totalorder %s1810_s6, 15  ;;  %v1176_v14 = vld [vmem:[%s2743_s4 + $0x48] sm:$0xff]  ;;  %v1177_v16 = vld [vmem:[%s2743_s4 + $0x50] sm:$0xff]  ;;  %v1178_v17 = vld [vmem:[%s2743_s4 + $0x58] sm:$0xff]  ;;  %v1616_v19 = vpack.c.bf16 %v1174_v12, %v1173_v11  ;;  %vm774_vm2 = vcmask 1046528  }
  0x14   : > { %1607 = vmatpush3.bf16.msra.mxu0 %v1604_v3  ;;  %1644 = vmatpush3.bf16.msra.mxu1 %v1604_v3  ;;  %s345_s14 = scalar_select %p344_p7, %s1497_s9, 0  ;;  %v437_v15 = vsub.s32 0, %v436_v10  ;;  %v1179_v18 = vld [vmem:[%s2743_s4 + $0x60] sm:$0xff]  ;;  %v1180_v20 = vld [vmem:[%s2743_s4 + $0x68] sm:$0xff]  ;;  %v1181_v21 = vld [vmem:[%s2743_s4 + $0x70] sm:$0xff]  ;;  %v620_v23 = vsub.s32 1, %v436_v10  ;;  %v1875_v27 = vpack.c.bf16 %v1176_v14, %v1175_v13  ;;  %v1877_v28 = vpack.c.bf16 %v1178_v17, %v1177_v16 }
  0x15   : > { %1609 = vmatprep.subr.bf16.mxu0 %v1608_v6  ;;  %1637 = vmatprep.subr.bf16.mxu1 %v1608_v6  ;;  %s1828_s15 = smul.u32 51, %s2875_s19  ;;  %s1510_s17 = sshll.u32 %s2875_s19, 5  ;;  %v1182_v22 = vld [vmem:[%s2743_s4 + $0x78] sm:$0xff]  ;;  %v414_v24 = vld [vmem:[%s2742_s3] sm:$0x7]  ;;  %v940_v26 = vsub.s32 2, %v436_v10  ;;  %v1885_v31 = vpack.c.bf16 %v1180_v20, %v1179_v18 }
  0x16   : > { %s2877_s14 = smov (!%p1498_p8, %s345_s14), 16  ;;  %p407_p10 = scmp.gt.s32.totalorder %s1718_s18, 0  ;;  %v415_v25 = vld [vmem:[%s2742_s3 + $0x4] sm:$0x7]  ;;  %v416_v29 = vld [vmem:[%s2742_s3 + $0x8] sm:$0x7]  ;;  %v1887_v32 = vpack.c.bf16 %v1182_v22, %v1181_v21  ;;  %v1901_v34 = vrot.slane %v414_v24, %v437_v15  ;;  %v1903_v35 = vrot.slane %v414_v24, %v620_v23 }
  0x17   : > { %s368_s7 = scalar_select %p367_p6, %s1810_s6, 16  ;;  %v1883_v30 = vrot.slane %v415_v25, %v437_v15  ;;  %v1894_v33 = vrot.slane %v416_v29, %v437_v15  ;;  %v1905_v36 = vrot.slane %v415_v25, %v620_v23  ;;  %v1921_v40 = vrot.slane %v416_v29, %v620_v23 }
  0x18   : > { %1611 = vmatpush3.bf16.msra.mxu0 %v1608_v6  ;;  %1645 = vmatpush3.bf16.msra.mxu1 %v1608_v6  ;;  %s1652_s16 = smul.u32 3, %s2877_s14  ;;  %s381_s13 = sadd.s32 8, %s1810_s6  ;;  %v1923_v41 = vrot.slane %v414_v24, %v940_v26  ;;  %v1925_v42 = vrot.slane %v415_v25, %v940_v26  ;;  %v1927_v43 = vrot.slane %v416_v29, %v940_v26  ;;  %vm1094_vm3 = vcmask 1045504  }
  0x19   : > { %1613 = vmatprep.subr.bf16.mxu0 %v1612_v9  ;;  %1638 = vmatprep.subr.bf16.mxu1 %v1612_v9  ;;  %s1654_s8 = smul.u32 3, %s368_s7  ;;  %p1909_p11 = scmp.lt.s32.totalorder %s381_s13, 16 }
  0x1a   : > { %s352_s14 = sadd.s32 %s1828_s15, %s1652_s16 }
  0x1b   : > { %s1503_s25 = sshll.u32 %s352_s14, 3  ;;  %s371_s26 = sadd.s32 %s1654_s8, %s1828_s15 }
  0x1c   : > { %1615 = vmatpush3.bf16.msra.mxu0 %v1612_v9  ;;  %1646 = vmatpush3.bf16.msra.mxu1 %v1612_v9  ;;  %s1892_s29 = scalar_lea.vmem %s2739_s0, %s1503_s25  ;;  %s1505_s30 = sshll.u32 %s371_s26, 3 }
  0x1d   : > { %1617 = vmatprep.subr.bf16.mxu0 %v1616_v19  ;;  %1639 = vmatprep.subr.bf16.mxu1 %v1616_v19  ;;  %s1899_s10 = scalar_lea.vmem %s2740_s1, %s1505_s30  ;;  %v404_v44 = vld [vmem:[%s1892_s29] sm:$0xff]  ;;  %v405_v58 = vld [vmem:[%s1892_s29 + $0x8] sm:$0xff]  ;;  %s2879_s13 = smov (!%p1909_p11, %s381_s13), 16 }
  0x1e   : > { %s1916_s11 = scalar_select %p396_p9, %s1810_s6, 15  ;;  %v417_v37 = vld [vmem:[%s1899_s10] sm:$0xff]  ;;  %v419_v38 = vld [vmem:[%s1899_s10 + $0x18] sm:$0xff]  ;;  %v528_v49 = vld [vmem:[%s1899_s10 + $0x9] sm:$0xff] }
  0x1f   : > { %v527_v39 = vld [vmem:[%s1899_s10 + $0x1] sm:$0xff]  ;;  %s1932_s12 = scalar_select %p407_p10, 1, 0  ;;  %v441_v45 = vmul.f32 %v1901_v34, %v417_v37  ;;  %v1936_v46 = vmul.f32 %v1901_v34, %v419_v38  ;;  %v459_v47 = vmul.f32 %v1883_v30, %v417_v37  ;;  %v461_v48 = vmul.f32 %v1883_v30, %v419_v38  ;;  %v529_v50 = vld [vmem:[%s1899_s10 + $0x19] sm:$0xff]  ;;  %v848_v57 = vld [vmem:[%s1899_s10 + $0xa] sm:$0xff] }
  0x20   : > { %v530_v51 = vld [vmem:[%s1899_s10 + $0x21] sm:$0xff]  ;;  %1619 = vmatpush3.bf16.msra.mxu0 %v1616_v19  ;;  %1647 = vmatpush3.bf16.msra.mxu1 %v1616_v19  ;;  %s1509_s18 = sshll.u32 %s1916_s11, 1  ;;  %v1945_v52 = vmul.f32 %v1894_v33, %v419_v38  ;;  %v1947_v53 = vrot.slane %v527_v39, 7  ;;  %v1949_v54 = vrot.slane %v528_v49, 7  ;;  %v1951_v55 = vrot.slane %v529_v50, 7  ;;  %v533_v5 = vld [vmem:[%s1899_s10 + $0x49] sm:$0xff] }
  0x21   : > { %2791 = vst [vmem:[#allocation2_spill] sm:$0xff] %v1936_v46  ;;  %v847_v56 = vld [vmem:[%s1899_s10 + $0x2] sm:$0xff]  ;;  %1621 = vmatprep.subr.bf16.mxu0 %v1875_v27  ;;  %1640 = vmatprep.subr.bf16.mxu1 %v1875_v27  ;;  %s1959_s25 = sadd.s32 %s1510_s17, %s1509_s18  ;;  %s409_s26 = scvt.s32.f32 %s1932_s12  ;;  %v1963_v59 = vrot.slane %v530_v51, 7  ;;  %v849_v60 = vld [vmem:[%s1899_s10 + $0x1a] sm:$0xff]  ;;  %v1969_v63 = vrot.slane %v848_v57, 6  ;;  %v1971_v0 = vadd.f32 %v461_v48, %v441_v45  ;;  %v534_v17 = vld [vmem:[%s1899_s10 + $0x51] sm:$0xff] }
  0x22   : > { %v850_v61 = vld [vmem:[%s1899_s10 + $0x22] sm:$0xff]  ;;  %v1967_v62 = vrot.slane %v847_v56, 6  ;;  %v564_v1 = vsel %vm561_vm0, %v1947_v53, %v1949_v54  ;;  %v650_v2 = vmul.f32 %v1905_v36, %v1947_v53  ;;  %v702_v3 = vmul.f32 %v1921_v40, %v1951_v55  ;;  %s1655_s19 = smul.u32 3, %s2879_s13  ;;  %s1511_s27 = sshll.u32 %s1959_s25, 3 }
  0x23   : > { %2792 = vst [vmem:[#allocation3_spill] sm:$0xff] %v1963_v59  ;;  %2793 = vst [vmem:[#allocation4_spill] sm:$0xff] %v1969_v63  ;;  %v1980_v4 = vrot.slane %v849_v60, 6  ;;  %v1983_v6 = vstv %s409_s26  ;;  %v567_v7 = vsel %vm561_vm0, %v1951_v55, %v1963_v59  ;;  %v1989_v8 = vmul.f32 %v1903_v35, %v564_v1  ;;  %v535_v23 = vld [vmem:[%s1899_s10 + $0x61] sm:$0xff] }
  0x24   : > { %v651_v9 = vmul.f32 %v1905_v36, %v564_v1  ;;  %1623 = vmatpush3.bf16.msra.mxu0 %v1875_v27  ;;  %1648 = vmatpush3.bf16.msra.mxu1 %v1875_v27  ;;  %v411_v10 = vmul.f32 %v1983_v6, %v404_v44  ;;  %v1996_v11 = vmul.f32 %v1983_v6, %v405_v58  ;;  %v2001_v13 = vrot.slane %v850_v61, 6  ;;  %v2039_v39 = vld [vmem:[%s1899_s10 + $0x48] sm:$0xff]  ;;  %s2044_s6 = sadd.s32 %s1655_s19, %s1828_s15  ;;  %v2055_v48 = vld [vmem:[%s1899_s10 + $0x60] sm:$0xff] }
  0x25   : > { %v1999_v12 = vmul.f32 %v1903_v35, %v567_v7  ;;  %1625 = vmatprep.subr.bf16.mxu0 %v1877_v28  ;;  %1641 = vmatprep.subr.bf16.mxu1 %v1877_v28  ;;  %v2010_v14 = vmul.f32 %v1905_v36, %v567_v7  ;;  %v703_v15 = vmul.f32 %v1921_v40, %v567_v7  ;;  %v2017_v18 = vrot.slane %v533_v5, 7  ;;  %v536_v58 = vld [vmem:[%s1899_s10 + $0x69] sm:$0xff]  ;;  %s1507_s15 = sshll.u32 %s2044_s6, 3 }
  0x26   : > { %2795 = vst [vmem:[#allocation6_spill] sm:$0xff] %v2001_v13  ;;  %v884_v16 = vsel %vm881_vm1, %v1967_v62, %v1969_v63  ;;  %v439_v19 = vmul.f32 %v1901_v34, %v411_v10  ;;  %v622_v20 = vmul.f32 %v1903_v35, %v411_v10  ;;  %v623_v21 = vmul.f32 %v1903_v35, %v1996_v11  ;;  %s2591_s7 = scalar_lea.vmem %s2741_s2, %s1507_s15 }
  0x27   : > { %2794 = vst [vmem:[#allocation5_spill] sm:$0xff] %v1999_v12  ;;  %2796 = vst [vmem:[#allocation7_spill] sm:$0xff] %v2017_v18  ;;  %v887_v22 = vsel %vm881_vm1, %v1980_v4, %v2001_v13  ;;  %v942_v24 = vmul.f32 %v1923_v41, %v411_v10  ;;  %v943_v25 = vmul.f32 %v1923_v41, %v1996_v11  ;;  %v2041_v44 = vrot.slane %v534_v17, 7  ;;  %v538_v17 = vld [vmem:[%s1899_s10 + $0x81] sm:$0xff] }
  0x28   : > { %v2031_v26 = vmul.f32 %v1923_v41, %v884_v16  ;;  %v2034_v27 = vmul.f32 %v1923_v41, %v887_v22  ;;  %1627 = vmatpush3.bf16.msra.mxu0 %v1877_v28  ;;  %1649 = vmatpush3.bf16.msra.mxu1 %v1877_v28  ;;  %v475_v29 = vadd.f32 %v459_v47, %v439_v19  ;;  %v2057_v49 = vrot.slane %v535_v23, 7 }
  0x29   : > { %v674_v37 = vadd.f32 %v650_v2, %v622_v20  ;;  %v675_v38 = vadd.f32 %v651_v9, %v623_v21  ;;  %2798 = vst [vmem:[#allocation9_spill] sm:$0xff] %v2039_v39  ;;  %2799 = vst [vmem:[#allocation10_spill] sm:$0xff] %v2041_v44  ;;  %1629 = vmatprep.subr.bf16.mxu0 %v1885_v31  ;;  %1642 = vmatprep.subr.bf16.mxu1 %v1885_v31  ;;  %v427_v2 = vld [vmem:[%s1899_s10 + $0x78] sm:$0xff]  ;;  %v2086_v19 = vrot.slane %v536_v58, 7 }
  0x2a   : > { %2797 = vst [vmem:[#allocation8_spill] sm:$0xff] %v2034_v27  ;;  %v970_v45 = vmul.f32 %v1925_v42, %v1967_v62  ;;  %v971_v28 = vmul.f32 %v1925_v42, %v884_v16  ;;  %v2052_v47 = vmul.f32 %v1925_v42, %v887_v22  ;;  %2800 = vst [vmem:[#allocation11_spill] sm:$0xff] %v2055_v48 }
  0x2b   : > { %2801 = vst [vmem:[#allocation12_spill] sm:$0xff] %v2057_v49  ;;  %v511_v50 = vadd.f32 %v1945_v52, %v475_v29  ;;  %v726_v51 = vadd.f32 %v702_v3, %v674_v37  ;;  %v2060_v56 = vadd.f32 %v703_v15, %v675_v38  ;;  %v1022_v57 = vmul.f32 %v1927_v43, %v1980_v4  ;;  %v853_v38 = vld [vmem:[%s1899_s10 + $0x4a] sm:$0xff] }
  0x2c   : > { %v994_v60 = vadd.f32 %v970_v45, %v942_v24  ;;  %v995_v61 = vadd.f32 %v971_v28, %v943_v25  ;;  %v1023_v1 = vmul.f32 %v1927_v43, %v887_v22  ;;  %v447_v5 = vmul.f32 %v1901_v34, %v2039_v39  ;;  %1631 = vmatpush3.bf16.msra.mxu0 %v1885_v31  ;;  %v2215_v39 = vld [vmem:[%s1899_s10 + $0x80] sm:$0xff] }
  0x2d   : > { %1650 = vmatpush3.bf16.msra.mxu1 %v1885_v31  ;;  %v775_v52 = vrot.slane %v726_v51, 1  ;;  %v2746_v3 = vrot.slane %v2060_v56, 1  ;;  %v2073_v7 = vmul.f32 %v1901_v34, %v427_v2  ;;  %v467_v9 = vmul.f32 %v1883_v30, %v2055_v48  ;;  %1633 = vmatprep.subr.bf16.mxu0 %v1887_v32  ;;  %v537_v31 = vld [vmem:[%s1899_s10 + $0x79] sm:$0xff]  ;;  %2803 = vst [vmem:[#allocation14_spill] sm:$0xff] %v2086_v19 }
  0x2e   : > { %1643 = vmatprep.subr.bf16.mxu1 %v1887_v32  ;;  %v1046_v10 = vadd.f32 %v1022_v57, %v994_v60  ;;  %v2079_v15 = vadd.f32 %v1023_v1, %v995_v61  ;;  %v2082_v16 = vmul.f32 %v1883_v30, %v427_v2  ;;  %v503_v22 = vmul.f32 %v1894_v33, %v427_v2  ;;  %v854_v61 = vld [vmem:[%s1899_s10 + $0x52] sm:$0xff]  ;;  %v855_v1 = vld [vmem:[%s1899_s10 + $0x62] sm:$0xff]  ;;  %v856_v2 = vld [vmem:[%s1899_s10 + $0x6a] sm:$0xff] }
  0x2f   : > { %2802 = vst [vmem:[#allocation13_spill] sm:$0xff] %v2073_v7  ;;  %v777_v20 = vsel %vm774_vm2, %v775_v52, %v2746_v3  ;;  %v483_v21 = vadd.f32 %v467_v9, %v447_v5  ;;  %v2095_v23 = vsel %vm561_vm0, %v2017_v18, %v2041_v44  ;;  %v2101_v37 = vsel %vm561_vm0, %v2057_v49, %v2086_v19 }
  0x30   : > { %2804 = vst [vmem:[#allocation15_spill] sm:$0xff] %v2095_v23  ;;  %v831_v24 = vadd.f32 %v777_v20, %v511_v50  ;;  %v1095_v25 = vrot.slane %v1046_v10, 2  ;;  %v2745_v29 = vrot.slane %v2079_v15, 2  ;;  %2805 = vst [vmem:[#allocation16_spill] sm:$0xff] %v2101_v37  ;;  %1635 = vmatpush3.bf16.msra.mxu0 %v1887_v32  ;;  %v2106_v28 = vrot.slane %v537_v31, 7  ;;  %v857_v10 = vld [vmem:[%s1899_s10 + $0x7a] sm:$0xff] }
  0x31   : > { %1651 = vmatpush3.bf16.msra.mxu1 %v1887_v32  ;;  %v519_v45 = vadd.f32 %v503_v22, %v483_v21  ;;  %v2108_v50 = vrot.slane %v538_v17, 7  ;;  %v634_v51 = vmul.f32 %v1903_v35, %v2017_v18  ;;  %v635_v58 = vmul.f32 %v1903_v35, %v2095_v23  ;;  %v858_v31 = vld [vmem:[%s1899_s10 + $0x82] sm:$0xff] }
  0x32   : > { %v1097_v57 = vsel %vm1094_vm3, %v1095_v25, %v2745_v29  ;;  %v662_v60 = vmul.f32 %v1905_v36, %v2057_v49  ;;  %v663_v32 = vmul.f32 %v1905_v36, %v2101_v37  ;;  %v714_v9 = vmul.f32 %v1921_v40, %v2106_v28 }
  0x33   : > { %v1151_v5 = vadd.f32 %v1097_v57, %v831_v24  ;;  %v579_v52 = vsel %vm561_vm0, %v2106_v28, %v2108_v50  ;;  %v2131_v17 = vrot.slane %v853_v38, 6  ;;  %v2140_v57 = vrot.slane %v854_v61, 6 }
  0x34   : > { %v2134_v20 = vmul.f32 %v1903_v35, %v579_v52  ;;  %v2137_v21 = vmul.f32 %v1905_v36, %v579_v52  ;;  %v686_v22 = vadd.f32 %v662_v60, %v634_v51  ;;  %v687_v24 = vadd.f32 %v663_v32, %v635_v58 }
  0x35   : > { %2806 = vst [vmem:[#allocation17_spill] sm:$0xff] %v2131_v17  ;;  %1580 = vmatprep.mubr.f32.mxu0 %v1151_v5  ;;  %v715_v25 = vmul.f32 %v1921_v40, %v579_v52  ;;  %2808 = vst [vmem:[#allocation19_spill] sm:$0xff] %v2140_v57  ;;  %v2142_v29 = vrot.slane %v855_v1, 6  ;;  %v2144_v38 = vrot.slane %v856_v2, 6  ;;  %v2146_v7 = vrot.slane %v857_v10, 6  ;;  %v2175_v10 = vld [vmem:[%s1899_s10 + $0x8] sm:$0xff] }
  0x36   : > { %2807 = vst [vmem:[#allocation18_spill] sm:$0xff] %v2134_v20  ;;  %v738_v3 = vadd.f32 %v714_v9, %v686_v22  ;;  %v2148_v20 = vrot.slane %v858_v31, 6  ;;  %v954_v51 = vmul.f32 %v1923_v41, %v2131_v17  ;;  %v2157_v60 = vsel %vm881_vm1, %v2131_v17, %v2140_v57  ;;  %v406_v1 = vld [vmem:[%s1892_s29 + $0x10] sm:$0x3]  ;;  %v2178_v31 = vld [vmem:[%s1899_s10 + $0x20] sm:$0xff]  ;;  %s2706_s29 = scalar_lea.vmem %s2744_s5, %s1511_s27 }
  0x37   : > { %2809 = vst [vmem:[#allocation20_spill] sm:$0xff] %v2142_v29  ;;  %2810 = vst [vmem:[#allocation21_spill] sm:$0xff] %v2144_v38  ;;  %v2152_v58 = vadd.f32 %v715_v25, %v687_v24  ;;  %v2162_v32 = vsel %vm881_vm1, %v2142_v29, %v2144_v38  ;;  %v982_v61 = vmul.f32 %v1925_v42, %v2142_v29 }
  0x38   : > { %2811 = vst [vmem:[#allocation22_spill] sm:$0xff] %v2157_v60  ;;  %2812 = vst [vmem:[#allocation23_spill] sm:$0xff] %v2162_v32  ;;  %v795_v2 = vrot.slane %v738_v3, 1  ;;  %v899_v5 = vsel %vm881_vm1, %v2146_v7, %v2148_v20  ;;  %v955_v52 = vmul.f32 %v1923_v41, %v2157_v60  ;;  %v983_v9 = vmul.f32 %v1925_v42, %v2162_v32 }
  0x39   : > { %v2755_v22 = vrot.slane %v2152_v58, 1  ;;  %v2182_v24 = vmul.f32 %v1923_v41, %v899_v5  ;;  %v2185_v3 = vmul.f32 %v1925_v42, %v899_v5  ;;  %v1006_v25 = vadd.f32 %v982_v61, %v954_v51 }
  0x3a   : > { %v1007_v27 = vadd.f32 %v983_v9, %v955_v52  ;;  %v1034_v60 = vmul.f32 %v1927_v43, %v2146_v7  ;;  %v1035_v17 = vmul.f32 %v1927_v43, %v899_v5  ;;  %v413_v23 = vmul.f32 %v1983_v6, %v406_v1  ;;  %v2204_v6 = vld [vmem:[%s1899_s10 + $0x50] sm:$0xff]  ;;  %v2207_v1 = vld [vmem:[%s1899_s10 + $0x68] sm:$0xff] }
  0x3b   : > { %2813 = vst [vmem:[#allocation24_spill] sm:$0xff] %v2182_v24  ;;  %v797_v12 = vsel %vm774_vm2, %v795_v2, %v2755_v22  ;;  %v440_v24 = vmul.f32 %v1901_v34, %v1996_v11  ;;  %v460_v18 = vmul.f32 %v1883_v30, %v2175_v10  ;;  %v496_v51 = vmul.f32 %v1894_v33, %v2178_v31 }
  0x3c   : > { %v839_v61 = vadd.f32 %v797_v12, %v519_v45  ;;  %v1058_v52 = vadd.f32 %v1034_v60, %v1006_v25  ;;  %v2200_v9 = vadd.f32 %v1035_v17, %v1007_v27  ;;  %v624_v5 = vmul.f32 %v1903_v35, %v413_v23  ;;  %2814 = vst [vmem:[#allocation25_spill] sm:$0xff] %v2204_v6 }
  0x3d   : > { %2815 = vst [vmem:[#allocation26_spill] sm:$0xff] %v2207_v1  ;;  %v476_v2 = vadd.f32 %v460_v18, %v440_v24  ;;  %v652_v11 = vmul.f32 %v1905_v36, %v1949_v54  ;;  %v704_v22 = vmul.f32 %v1921_v40, %v1963_v59  ;;  %v944_v46 = vmul.f32 %v1923_v41, %v413_v23 }
  0x3e   : > { %v1115_v12 = vrot.slane %v1058_v52, 2  ;;  %v1116_v27 = vrot.slane %v2200_v9, 2  ;;  %v972_v45 = vmul.f32 %v1925_v42, %v1969_v63  ;;  %v1024_v18 = vmul.f32 %v1927_v43, %v2001_v13 }
  0x3f   : > { %v512_v17 = vadd.f32 %v496_v51, %v476_v2  ;;  %v676_v60 = vadd.f32 %v652_v11, %v624_v5  ;;  %v448_v24 = vmul.f32 %v1901_v34, %v2204_v6  ;;  %v468_v23 = vmul.f32 %v1883_v30, %v2207_v1  ;;  %v2234_v2 = vld [vmem:[%s1899_s10 + $0x30] sm:$0xff] }
  0x40   : > { %v1117_v25 = vsel %vm1094_vm3, %v1115_v12, %v1116_v27  ;;  %v996_v52 = vadd.f32 %v972_v45, %v944_v46  ;;  %v504_v9 = vmul.f32 %v1894_v33, %v2215_v39  ;;  %v636_v63 = vmul.f32 %v1903_v35, %v2041_v44  ;;  %2816 = vst [vmem:[#allocation27_spill] sm:$0xff] %v2234_v2  ;;  %v531_v11 = vld [vmem:[%s1899_s10 + $0x31] sm:$0xff]  ;;  %v532_v44 = vld [vmem:[%s1899_s10 + $0x39] sm:$0xff] }
  0x41   : > { %v1159_v59 = vadd.f32 %v1117_v25, %v839_v61  ;;  %v728_v13 = vadd.f32 %v704_v22, %v676_v60  ;;  %v484_v51 = vadd.f32 %v468_v23, %v448_v24  ;;  %v664_v5 = vmul.f32 %v1905_v36, %v2086_v19 }
  0x42   : > { %v1048_v6 = vadd.f32 %v1024_v18, %v996_v52  ;;  %v716_v12 = vmul.f32 %v1921_v40, %v2108_v50  ;;  %v956_v46 = vmul.f32 %v1923_v41, %v2140_v57  ;;  %v984_v45 = vmul.f32 %v1925_v42, %v2144_v38 }
  0x43   : > { %1592 = vmatprep.mubr.f32.mxu1 %v1159_v59  ;;  %v778_v22 = vrot.slane %v728_v13, 1  ;;  %v520_v61 = vadd.f32 %v504_v9, %v484_v51  ;;  %v688_v60 = vadd.f32 %v664_v5, %v636_v63  ;;  %v1036_v24 = vmul.f32 %v1927_v43, %v2148_v20 }
  0x44   : > { %v1098_v18 = vrot.slane %v1048_v6, 2  ;;  %v1008_v23 = vadd.f32 %v984_v45, %v956_v46  ;;  %v497_v25 = vmul.f32 %v1894_v33, %v2234_v2  ;;  %v2248_v52 = vrot.slane %v531_v11, 7  ;;  %v851_v11 = vld [vmem:[%s1899_s10 + $0x32] sm:$0xff]  ;;  %v852_v45 = vld [vmem:[%s1899_s10 + $0x3a] sm:$0xff] }
  0x45   : > { %v2817_v57 = vrot.slane %v2060_v56, 1  ;;  %v740_v59 = vadd.f32 %v716_v12, %v688_v60  ;;  %v2253_v13 = vrot.slane %v532_v44, 7  ;;  %v625_v63 = vmul.f32 %v1903_v35, %v1947_v53 }
  0x46   : > { %v2819_v51 = vrot.slane %v2079_v15, 2  ;;  %v1060_v5 = vadd.f32 %v1036_v24, %v1008_v23  ;;  %v513_v46 = vadd.f32 %v497_v25, %v1971_v0  ;;  %v653_v53 = vmul.f32 %v1905_v36, %v1951_v55  ;;  %v2289_v25 = vld [vmem:[%s1899_s10 + $0x90] sm:$0xff] }
  0x47   : > { %v779_v38 = vsel %vm774_vm2, %v2817_v57, %v778_v22  ;;  %2818 = vst [vmem:[#allocation28_spill] sm:$0xff] %v2253_v13  ;;  %v798_v2 = vrot.slane %v740_v59, 1  ;;  %v2266_v56 = vsel %vm561_vm0, %v2248_v52, %v2253_v13  ;;  %v678_v44 = vadd.f32 %v2010_v14, %v1989_v8 }
  0x48   : > { %v832_v9 = vadd.f32 %v779_v38, %v512_v17  ;;  %v1099_v6 = vsel %vm1094_vm3, %v2819_v51, %v1098_v18  ;;  %v1118_v57 = vrot.slane %v1060_v5, 2  ;;  %v705_v0 = vmul.f32 %v1921_v40, %v2248_v52 }
  0x49   : > { %v706_v38 = vmul.f32 %v1921_v40, %v2266_v56  ;;  %v2820_v17 = vrot.slane %v2152_v58, 1  ;;  %v677_v22 = vadd.f32 %v653_v53, %v625_v63  ;;  %v2279_v60 = vrot.slane %v851_v11, 6  ;;  %v540_v63 = vld [vmem:[%s1899_s10 + $0x99] sm:$0xff] }
  0x4a   : > { %v1152_v15 = vadd.f32 %v1099_v6, %v832_v9  ;;  %v2281_v24 = vrot.slane %v852_v45, 6  ;;  %v1119_v14 = vsel %vm1094_vm3, %v1116_v27, %v1118_v57  ;;  %v945_v23 = vmul.f32 %v1923_v41, %v1967_v62  ;;  %v539_v27 = vld [vmem:[%s1899_s10 + $0x91] sm:$0xff] }
  0x4b   : > { %v799_v12 = vsel %vm774_vm2, %v2820_v17, %v798_v2  ;;  %v2284_v18 = vadd.f32 %v706_v38, %v678_v44  ;;  %v729_v58 = vadd.f32 %v705_v0, %v677_v22  ;;  %v973_v59 = vmul.f32 %v1925_v42, %v1980_v4  ;;  %v860_v22 = vld [vmem:[%s1899_s10 + $0x9a] sm:$0xff] }
  0x4c   : > { %1581 = vmatmul.mubr.f32.vlgmr.msra.gmra.mrb[0].mxu0 %v1152_v15  ;;  %v840_v8 = vadd.f32 %v799_v12, %v520_v61  ;;  %v2294_v2 = vsel %vm881_vm1, %v2279_v60, %v2281_v24  ;;  %v998_v61 = vadd.f32 %v2052_v47, %v2031_v26  ;;  %v1025_v62 = vmul.f32 %v1927_v43, %v2279_v60  ;;  %v859_v12 = vld [vmem:[%s1899_s10 + $0x92] sm:$0xff] }
  0x4d   : > { %v2774_v51 = vrot.slane %v2284_v18, 1  ;;  %v1026_v6 = vmul.f32 %v1927_v43, %v2294_v2  ;;  %v780_v5 = vrot.slane %v729_v58, 1  ;;  %v997_v11 = vadd.f32 %v973_v59, %v945_v23 }
  0x4e   : > { %v1160_v9 = vadd.f32 %v1119_v14, %v840_v8  ;;  %v449_v45 = vmul.f32 %v1901_v34, %v2055_v48  ;;  %v505_v26 = vmul.f32 %v1894_v33, %v2289_v25  ;;  %v2313_v53 = vrot.slane %v539_v27, 7 }
  0x4f   : > { %v2311_v47 = vadd.f32 %v1026_v6, %v998_v61  ;;  %v2315_v44 = vrot.slane %v540_v63, 7  ;;  %v637_v15 = vmul.f32 %v1903_v35, %v2057_v49  ;;  %v782_v57 = vsel %vm774_vm2, %v780_v5, %v2774_v51  ;;  %v2825_v51 = vld [vmem:[#allocation6_spill] sm:$0xff] }
  0x50   : > { %1593 = vmatmul.mubr.f32.vlgmr.msra.gmra.mrb[0].mxu1 %v1160_v9  ;;  %v1049_v0 = vadd.f32 %v1025_v62, %v997_v11  ;;  %v485_v38 = vadd.f32 %v2082_v16, %v449_v45  ;;  %v638_v17 = vmul.f32 %v1903_v35, %v2101_v37  ;;  %v833_v8 = vadd.f32 %v782_v57, %v513_v46  ;;  %v2830_v49 = vld [vmem:[#allocation2_spill] sm:$0xff] }
  0x51   : > { %v2773_v14 = vrot.slane %v2311_v47, 2  ;;  %v2331_v23 = vsel %vm561_vm0, %v2313_v53, %v2315_v44  ;;  %v665_v58 = vmul.f32 %v1905_v36, %v2106_v28  ;;  %v717_v27 = vmul.f32 %v1921_v40, %v2313_v53 }
  0x52   : > { %v1100_v59 = vrot.slane %v1049_v0, 2  ;;  %v521_v61 = vadd.f32 %v505_v26, %v485_v38  ;;  %v690_v16 = vadd.f32 %v2137_v21, %v638_v17  ;;  %v718_v46 = vmul.f32 %v1921_v40, %v2331_v23  ;;  %v2361_v0 = vld [vmem:[%s1899_s10 + $0x38] sm:$0xff] }
  0x53   : > { %v689_v63 = vadd.f32 %v665_v58, %v637_v15  ;;  %v2340_v9 = vrot.slane %v859_v12, 6  ;;  %v2342_v62 = vrot.slane %v860_v22, 6  ;;  %v957_v5 = vmul.f32 %v1923_v41, %v2142_v29  ;;  %2822 = vst [vmem:[#allocation30_spill] sm:$0xff] %v2361_v0 }
  0x54   : > { %v1102_v6 = vsel %vm1094_vm3, %v1100_v59, %v2773_v14  ;;  %v958_v21 = vmul.f32 %v1923_v41, %v2162_v32  ;;  %v985_v11 = vmul.f32 %v1925_v42, %v2146_v7  ;;  %v2353_v15 = vadd.f32 %v718_v46, %v690_v16 }
  0x55   : > { %v1153_v45 = vadd.f32 %v1102_v6, %v833_v8  ;;  %v741_v26 = vadd.f32 %v717_v27, %v689_v63  ;;  %v2358_v57 = vsel %vm881_vm1, %v2340_v9, %v2342_v62  ;;  %v1037_v12 = vmul.f32 %v1927_v43, %v2340_v9 }
  0x56   : > { %2821 = vst [vmem:[#allocation29_spill] sm:$0xff] %v2358_v57  ;;  %v1009_v38 = vadd.f32 %v985_v11, %v957_v5  ;;  %v1010_v17 = vadd.f32 %v2185_v3, %v958_v21  ;;  %v1038_v22 = vmul.f32 %v1927_v43, %v2358_v57  ;;  %v2775_v58 = vrot.slane %v2353_v15, 1  ;;  %v2823_v21 = vld [vmem:[#allocation3_spill] sm:$0xff] }
  0x57   : > { %1583 = vmatprep.mubr.f32.mxu0 %v1153_v45  ;;  %v800_v8 = vrot.slane %v741_v26, 1  ;;  %v442_v59 = vmul.f32 %v1901_v34, %v2175_v10  ;;  %v462_v16 = vmul.f32 %v1883_v30, %v2178_v31  ;;  %v498_v3 = vmul.f32 %v1894_v33, %v2361_v0  ;;  %v2387_v45 = vld [vmem:[%s1899_s10 + $0x98] sm:$0xff] }
  0x58   : > { %v1061_v27 = vadd.f32 %v1037_v12, %v1009_v38  ;;  %v2373_v63 = vadd.f32 %v1038_v22, %v1010_v17  ;;  %v627_v46 = vmul.f32 %v1903_v35, %v1949_v54  ;;  %v655_v10 = vmul.f32 %v1905_v36, %v2823_v21  ;;  %v2824_v12 = vld [vmem:[#allocation4_spill] sm:$0xff] }
  0x59   : > { %v802_v6 = vsel %vm774_vm2, %v800_v8, %v2775_v58  ;;  %v478_v5 = vadd.f32 %v462_v16, %v442_v59  ;;  %v707_v11 = vmul.f32 %v1921_v40, %v2253_v13  ;;  %v947_v54 = vmul.f32 %v1923_v41, %v2824_v12  ;;  %v2826_v12 = vld [vmem:[#allocation21_spill] sm:$0xff] }
  0x5a   : > { %v841_v26 = vadd.f32 %v802_v6, %v521_v61  ;;  %v1120_v38 = vrot.slane %v1061_v27, 2  ;;  %v1121_v17 = vrot.slane %v2373_v63, 2  ;;  %v679_v14 = vadd.f32 %v655_v10, %v627_v46 }
  0x5b   : > { %v514_v22 = vadd.f32 %v498_v3, %v478_v5  ;;  %v975_v8 = vmul.f32 %v1925_v42, %v2825_v51  ;;  %v1027_v59 = vmul.f32 %v1927_v43, %v2281_v24  ;;  %v450_v58 = vmul.f32 %v1901_v34, %v2207_v1 }
  0x5c   : > { %v1122_v16 = vsel %vm1094_vm3, %v1120_v38, %v1121_v17  ;;  %v470_v61 = vmul.f32 %v1883_v30, %v2215_v39  ;;  %v506_v27 = vmul.f32 %v1894_v33, %v2387_v45  ;;  %v731_v3 = vadd.f32 %v707_v11, %v679_v14 }
  0x5d   : > { %v1161_v63 = vadd.f32 %v1122_v16, %v841_v26  ;;  %v999_v46 = vadd.f32 %v975_v8, %v947_v54  ;;  %v639_v6 = vmul.f32 %v1903_v35, %v2086_v19  ;;  %v667_v10 = vmul.f32 %v1905_v36, %v2108_v50  ;;  %v2827_v54 = vld [vmem:[#allocation27_spill] sm:$0xff]  ;;  %v2828_v16 = vld [vmem:[#allocation9_spill] sm:$0xff] }
  0x5e   : > { %v486_v5 = vadd.f32 %v470_v61, %v450_v58  ;;  %v719_v38 = vmul.f32 %v1921_v40, %v2315_v44  ;;  %v959_v1 = vmul.f32 %v1923_v41, %v2826_v12  ;;  %v783_v32 = vrot.slane %v731_v3, 1 }
  0x5f   : > { %1595 = vmatprep.mubr.f32.mxu1 %v1161_v63  ;;  %v1051_v29 = vadd.f32 %v1027_v59, %v999_v46  ;;  %v987_v14 = vmul.f32 %v1925_v42, %v2148_v20  ;;  %v1039_v11 = vmul.f32 %v1927_v43, %v2342_v62  ;;  %v691_v58 = vadd.f32 %v667_v10, %v639_v6 }
  0x60   : > { %v522_v26 = vadd.f32 %v506_v27, %v486_v5  ;;  %v463_v8 = vmul.f32 %v1883_v30, %v2827_v54  ;;  %v499_v61 = vmul.f32 %v1894_v33, %v2828_v16  ;;  %v2829_v19 = vrot.slane %v2284_v18, 1 }
  0x61   : > { %v1103_v3 = vrot.slane %v1051_v29, 2  ;;  %v1011_v59 = vadd.f32 %v987_v14, %v959_v1  ;;  %v628_v46 = vmul.f32 %v1903_v35, %v1951_v55  ;;  %v743_v37 = vadd.f32 %v719_v38, %v691_v58  ;;  %v2832_v29 = vld [vmem:[#allocation7_spill] sm:$0xff]  ;;  %v2833_v38 = vld [vmem:[#allocation5_spill] sm:$0xff] }
  0x62   : > { %v784_v63 = vsel %vm774_vm2, %v2829_v19, %v783_v32  ;;  %v479_v27 = vadd.f32 %v463_v8, %v2830_v49  ;;  %v656_v6 = vmul.f32 %v1905_v36, %v2248_v52  ;;  %v2831_v5 = vrot.slane %v2311_v47, 2  ;;  %v2834_v47 = vld [vmem:[#allocation15_spill] sm:$0xff] }
  0x63   : > { %v834_v12 = vadd.f32 %v784_v63, %v514_v22  ;;  %v1063_v48 = vadd.f32 %v1039_v11, %v1011_v59  ;;  %v657_v19 = vmul.f32 %v1905_v36, %v2266_v56  ;;  %v708_v32 = vmul.f32 %v1921_v40, %v2832_v29 }
  0x64   : > { %v1104_v10 = vsel %vm1094_vm3, %v2831_v5, %v1103_v3  ;;  %v803_v1 = vrot.slane %v743_v37, 1  ;;  %v515_v18 = vadd.f32 %v499_v61, %v479_v27  ;;  %v680_v49 = vadd.f32 %v656_v6, %v628_v46  ;;  %v2447_v61 = vld [vmem:[%s1899_s10 + $0xa8] sm:$0xff]  ;;  %v542_v6 = vld [vmem:[%s1899_s10 + $0xb1] sm:$0xff] }
  0x65   : > { %v1154_v55 = vadd.f32 %v1104_v10, %v834_v12  ;;  %v1123_v22 = vrot.slane %v1063_v48, 2  ;;  %v681_v14 = vadd.f32 %v657_v19, %v2833_v38  ;;  %v709_v58 = vmul.f32 %v1921_v40, %v2834_v47  ;;  %v2837_v19 = vld [vmem:[#allocation8_spill] sm:$0xff] }
  0x66   : > { %v948_v11 = vmul.f32 %v1923_v41, %v1980_v4  ;;  %v2835_v8 = vrot.slane %v2353_v15, 1  ;;  %v732_v12 = vadd.f32 %v708_v32, %v680_v49  ;;  %v976_v37 = vmul.f32 %v1925_v42, %v2279_v60  ;;  %v2836_v4 = vld [vmem:[#allocation17_spill] sm:$0xff]  ;;  %v541_v15 = vld [vmem:[%s1899_s10 + $0xa9] sm:$0xff] }
  0x67   : > { %1584 = vmatmul.mubr.f32.gmra.mrb[2].mxu0 %v1154_v55  ;;  %v977_v48 = vmul.f32 %v1925_v42, %v2294_v2  ;;  %v1124_v59 = vsel %vm1094_vm3, %v1121_v17, %v1123_v22  ;;  %v2450_v46 = vadd.f32 %v709_v58, %v681_v14  ;;  %v1028_v27 = vmul.f32 %v1927_v43, %v2836_v4  ;;  %v2838_v55 = vld [vmem:[#allocation22_spill] sm:$0xff] }
  0x68   : > { %v804_v63 = vsel %vm774_vm2, %v2835_v8, %v803_v1  ;;  %v785_v5 = vrot.slane %v732_v12, 1  ;;  %v1000_v10 = vadd.f32 %v976_v37, %v948_v11  ;;  %v1029_v1 = vmul.f32 %v1927_v43, %v2838_v55 }
  0x69   : > { %v842_v3 = vadd.f32 %v804_v63, %v522_v26  ;;  %v1001_v32 = vadd.f32 %v977_v48, %v2837_v19  ;;  %v2784_v26 = vrot.slane %v2450_v46, 1  ;;  %v471_v17 = vmul.f32 %v1883_v30, %v2289_v25  ;;  %v2839_v63 = vld [vmem:[#allocation13_spill] sm:$0xff] }
  0x6a   : > { %v507_v22 = vmul.f32 %v1894_v33, %v2447_v61  ;;  %v1052_v38 = vadd.f32 %v1028_v27, %v1000_v10  ;;  %v2466_v58 = vrot.slane %v541_v15, 7  ;;  %v2468_v11 = vrot.slane %v542_v6, 7 }
  0x6b   : > { %v1162_v49 = vadd.f32 %v1124_v59, %v842_v3  ;;  %v2464_v14 = vadd.f32 %v1029_v1, %v1001_v32  ;;  %v787_v8 = vsel %vm774_vm2, %v785_v5, %v2784_v26  ;;  %v487_v12 = vadd.f32 %v471_v17, %v2839_v63  ;;  %v861_v3 = vld [vmem:[%s1899_s10 + $0xaa] sm:$0xff]  ;;  %v862_v59 = vld [vmem:[%s1899_s10 + $0xb2] sm:$0xff] }
  0x6c   : > { %v640_v37 = vmul.f32 %v1903_v35, %v2106_v28  ;;  %v668_v48 = vmul.f32 %v1905_v36, %v2313_v53  ;;  %v835_v27 = vadd.f32 %v787_v8, %v515_v18  ;;  %v1105_v15 = vrot.slane %v1052_v38, 2 }
  0x6d   : > { %1596 = vmatmul.mubr.f32.gmra.mrb[2].mxu1 %v1162_v49  ;;  %v2783_v6 = vrot.slane %v2464_v14, 2  ;;  %v2484_v10 = vsel %vm561_vm0, %v2466_v58, %v2468_v11  ;;  %v523_v5 = vadd.f32 %v507_v22, %v487_v12  ;;  %v669_v19 = vmul.f32 %v1905_v36, %v2331_v23  ;;  %v2841_v22 = vld [vmem:[#allocation18_spill] sm:$0xff] }
  0x6e   : > { %v692_v32 = vadd.f32 %v668_v48, %v640_v37  ;;  %v720_v28 = vmul.f32 %v1921_v40, %v2466_v58  ;;  %v721_v1 = vmul.f32 %v1921_v40, %v2484_v10  ;;  %v2495_v49 = vrot.slane %v861_v3, 6 }
  0x6f   : > { %v1107_v18 = vsel %vm1094_vm3, %v1105_v15, %v2783_v6  ;;  %v2497_v17 = vrot.slane %v862_v59, 6  ;;  %v693_v8 = vadd.f32 %v669_v19, %v2841_v22  ;;  %v960_v12 = vmul.f32 %v1923_v41, %v2146_v7  ;;  %v2844_v6 = vld [vmem:[#allocation25_spill] sm:$0xff] }
  0x70   : > { %2840 = vst [vmem:[#allocation3_spill] sm:$0xff] %v2495_v49  ;;  %v1155_v38 = vadd.f32 %v1107_v18, %v835_v27  ;;  %v744_v63 = vadd.f32 %v720_v28, %v692_v32  ;;  %v988_v48 = vmul.f32 %v1925_v42, %v2340_v9  ;;  %v989_v3 = vmul.f32 %v1925_v42, %v2358_v57  ;;  %v2843_v28 = vld [vmem:[#allocation24_spill] sm:$0xff] }
  0x71   : > { %v2505_v37 = vsel %vm881_vm1, %v2495_v49, %v2497_v17  ;;  %v1040_v59 = vmul.f32 %v1927_v43, %v2495_v49  ;;  %v2513_v27 = vadd.f32 %v721_v1, %v693_v8  ;;  %v444_v19 = vmul.f32 %v1901_v34, %v2178_v31  ;;  %v2539_v49 = vld [vmem:[%s1899_s10 + $0xb0] sm:$0xff] }
  0x72   : > { %2842 = vst [vmem:[#allocation4_spill] sm:$0xff] %v2505_v37  ;;  %1586 = vmatprep.mubr.f32.mxu0 %v1155_v38  ;;  %v805_v15 = vrot.slane %v744_v63, 1  ;;  %v1041_v7 = vmul.f32 %v1927_v43, %v2505_v37  ;;  %v1012_v32 = vadd.f32 %v988_v48, %v960_v12  ;;  %v1013_v18 = vadd.f32 %v989_v3, %v2843_v28  ;;  %v2845_v63 = vld [vmem:[#allocation10_spill] sm:$0xff]  ;;  %v2846_v37 = vld [vmem:[#allocation19_spill] sm:$0xff] }
  0x73   : > { %v464_v22 = vmul.f32 %v1883_v30, %v2361_v0  ;;  %v500_v26 = vmul.f32 %v1894_v33, %v2844_v6  ;;  %v806_v1 = vrot.slane %v2513_v27, 1  ;;  %v630_v38 = vmul.f32 %v1903_v35, %v2823_v21 }
  0x74   : > { %v658_v8 = vmul.f32 %v1905_v36, %v2253_v13  ;;  %v710_v31 = vmul.f32 %v1921_v40, %v2845_v63  ;;  %v1064_v12 = vadd.f32 %v1040_v59, %v1012_v32  ;;  %v1065_v48 = vadd.f32 %v1041_v7, %v1013_v18 }
  0x75   : > { %v480_v3 = vadd.f32 %v464_v22, %v444_v19  ;;  %v950_v28 = vmul.f32 %v1923_v41, %v2825_v51  ;;  %v807_v0 = vsel %vm774_vm2, %v805_v15, %v806_v1  ;;  %v978_v27 = vmul.f32 %v1925_v42, %v2281_v24 }
  0x76   : > { %v682_v6 = vadd.f32 %v658_v8, %v630_v38  ;;  %v1030_v21 = vmul.f32 %v1927_v43, %v2846_v37  ;;  %v843_v13 = vadd.f32 %v807_v0, %v523_v5  ;;  %v1125_v57 = vrot.slane %v1064_v12, 2 }
  0x77   : > { %v1126_v63 = vrot.slane %v1065_v48, 2  ;;  %v516_v59 = vadd.f32 %v500_v26, %v480_v3  ;;  %v1002_v19 = vadd.f32 %v978_v27, %v950_v28  ;;  %v452_v51 = vmul.f32 %v1901_v34, %v2215_v39 }
  0x78   : > { %v734_v7 = vadd.f32 %v710_v31, %v682_v6  ;;  %v472_v15 = vmul.f32 %v1883_v30, %v2387_v45  ;;  %v508_v18 = vmul.f32 %v1894_v33, %v2539_v49  ;;  %v642_v22 = vmul.f32 %v1903_v35, %v2108_v50 }
  0x79   : > { %v1127_v32 = vsel %vm1094_vm3, %v1125_v57, %v1126_v63  ;;  %v670_v0 = vmul.f32 %v1905_v36, %v2315_v44  ;;  %v1054_v5 = vadd.f32 %v1030_v21, %v1002_v19  ;;  %v722_v39 = vmul.f32 %v1921_v40, %v2468_v11 }
  0x7a   : > { %v1163_v26 = vadd.f32 %v1127_v32, %v843_v13  ;;  %v788_v6 = vrot.slane %v734_v7, 1  ;;  %v488_v38 = vadd.f32 %v472_v15, %v452_v51  ;;  %v962_v57 = vmul.f32 %v1923_v41, %v2148_v20  ;;  %v2849_v51 = vld [vmem:[#allocation11_spill] sm:$0xff] }
  0x7b   : > { %v694_v8 = vadd.f32 %v670_v0, %v642_v22  ;;  %v990_v31 = vmul.f32 %v1925_v42, %v2342_v62  ;;  %v2847_v50 = vrot.slane %v2450_v46, 1  ;;  %v1108_v13 = vrot.slane %v1054_v5, 2 }
  0x7c   : > { %1598 = vmatprep.mubr.f32.mxu1 %v1163_v26  ;;  %v524_v48 = vadd.f32 %v508_v18, %v488_v38  ;;  %v1042_v3 = vmul.f32 %v1927_v43, %v2497_v17  ;;  %v445_v7 = vmul.f32 %v1901_v34, %v2827_v54  ;;  %v2848_v20 = vrot.slane %v2464_v14, 2  ;;  %v2850_v26 = vld [vmem:[#allocation12_spill] sm:$0xff] }
  0x7d   : > { %v789_v12 = vsel %vm774_vm2, %v2847_v50, %v788_v6  ;;  %v746_v27 = vadd.f32 %v722_v39, %v694_v8  ;;  %v1014_v21 = vadd.f32 %v990_v31, %v962_v57  ;;  %v465_v46 = vmul.f32 %v1883_v30, %v2828_v16  ;;  %v2851_v38 = vld [vmem:[#allocation16_spill] sm:$0xff] }
  0x7e   : > { %v836_v28 = vadd.f32 %v789_v12, %v516_v59  ;;  %v1109_v19 = vsel %vm1094_vm3, %v2848_v20, %v1108_v13  ;;  %v501_v15 = vmul.f32 %v1894_v33, %v2849_v51  ;;  %v631_v32 = vmul.f32 %v1903_v35, %v2248_v52  ;;  %v433_v12 = vld [vmem:[%s2591_s7] sm:$0xff] }
  0x7f   : > { %v808_v18 = vrot.slane %v746_v27, 1  ;;  %v1066_v22 = vadd.f32 %v1042_v3, %v1014_v21  ;;  %v632_v54 = vmul.f32 %v1903_v35, %v2266_v56  ;;  %v481_v0 = vadd.f32 %v465_v46, %v445_v7  ;;  %v543_v21 = vld [vmem:[%s2591_s7 + $0x1] sm:$0xff]  ;;  %v2607_v7 = vld [vmem:[%s2591_s7 + $0x9] sm:$0xff] }
  0x80   : > { %v1156_v59 = vadd.f32 %v1109_v19, %v836_v28  ;;  %v659_v14 = vmul.f32 %v1905_v36, %v2832_v29  ;;  %v660_v16 = vmul.f32 %v1905_v36, %v2834_v47  ;;  %v711_v6 = vmul.f32 %v1921_v40, %v2850_v26 }
  0x81   : > { %v809_v52 = vsel %vm774_vm2, %v806_v1, %v808_v18  ;;  %v1128_v5 = vrot.slane %v1066_v22, 2  ;;  %v712_v8 = vmul.f32 %v1921_v40, %v2851_v38  ;;  %v951_v56 = vmul.f32 %v1923_v41, %v2279_v60 }
  0x82   : > { %1587 = vmatmul.mubr.f32.gmra.mrb[4].mxu0 %v1156_v59  ;;  %v844_v29 = vadd.f32 %v809_v52, %v524_v48  ;;  %v517_v47 = vadd.f32 %v501_v15, %v481_v0  ;;  %v683_v39 = vadd.f32 %v659_v14, %v631_v32  ;;  %v684_v57 = vadd.f32 %v660_v16, %v632_v54  ;;  %v2852_v48 = vld [vmem:[#allocation20_spill] sm:$0xff] }
  0x83   : > { %v1129_v1 = vsel %vm1094_vm3, %v1126_v63, %v1128_v5  ;;  %v952_v31 = vmul.f32 %v1923_v41, %v2294_v2  ;;  %v979_v60 = vmul.f32 %v1925_v42, %v2836_v4  ;;  %v980_v50 = vmul.f32 %v1925_v42, %v2838_v55  ;;  %v2853_v2 = vld [vmem:[#allocation23_spill] sm:$0xff] }
  0x84   : > { %v1164_v13 = vadd.f32 %v1129_v1, %v844_v29  ;;  %v735_v3 = vadd.f32 %v711_v6, %v683_v39  ;;  %v2601_v28 = vadd.f32 %v712_v8, %v684_v57  ;;  %v1031_v27 = vmul.f32 %v1927_v43, %v2852_v48  ;;  %v2629_v16 = vld [vmem:[%s2591_s7 + $0xa] sm:$0xff] }
  0x85   : > { %v1003_v63 = vadd.f32 %v979_v60, %v951_v56  ;;  %v1004_v20 = vadd.f32 %v980_v50, %v952_v31  ;;  %v1032_v4 = vmul.f32 %v1927_v43, %v2853_v2  ;;  %v453_v55 = vmul.f32 %v1901_v34, %v2289_v25 }
  0x86   : > { %1599 = vmatmul.mubr.f32.gmra.mrb[4].mxu1 %v1164_v13  ;;  %v790_v19 = vrot.slane %v735_v3, 1  ;;  %v791_v46 = vrot.slane %v2601_v28, 1  ;;  %v473_v51 = vmul.f32 %v1883_v30, %v2447_v61  ;;  %v509_v15 = vmul.f32 %v1894_v33, %v433_v12  ;;  %v863_v61 = vld [vmem:[%s2591_s7 + $0x2] sm:$0xff]  ;;  %v2856_v3 = vld [vmem:[#allocation4_spill] sm:$0xff] }
  0x87   : > { %v1055_v32 = vadd.f32 %v1031_v27, %v1003_v63  ;;  %v2617_v59 = vadd.f32 %v1032_v4, %v1004_v20  ;;  %v612_v18 = vrot.slane %v543_v21, 7  ;;  %v613_v22 = vrot.slane %v2607_v7, 7  ;;  %v2855_v12 = vld [vmem:[#allocation3_spill] sm:$0xff]  ;;  %v2857_v4 = vld [vmem:[#allocation30_spill] sm:$0xff] }
  0x88   : > { %v792_v54 = vsel %vm774_vm2, %v790_v19, %v791_v46  ;;  %v489_v25 = vadd.f32 %v473_v51, %v453_v55  ;;  %v643_v0 = vmul.f32 %v1903_v35, %v2313_v53  ;;  %v644_v14 = vmul.f32 %v1903_v35, %v2331_v23  ;;  %v2858_v19 = vld [vmem:[#allocation25_spill] sm:$0xff] }
  0x89   : > { %v837_v26 = vadd.f32 %v792_v54, %v517_v47  ;;  %v1110_v6 = vrot.slane %v1055_v32, 2  ;;  %v1111_v52 = vrot.slane %v2617_v59, 2  ;;  %v614_v5 = vsel %vm561_vm0, %v612_v18, %v613_v22 }
  0x8a   : > { %v525_v38 = vadd.f32 %v509_v15, %v489_v25  ;;  %v671_v8 = vmul.f32 %v1905_v36, %v2466_v58  ;;  %v672_v53 = vmul.f32 %v1905_v36, %v2484_v10  ;;  %v723_v23 = vmul.f32 %v1921_v40, %v612_v18  ;;  %v2854_v10 = vld [vmem:[#allocation29_spill] sm:$0xff]  ;;  %v2859_v18 = vld [vmem:[#allocation26_spill] sm:$0xff]  ;;  %v2860_v25 = vld [vmem:[#allocation28_spill] sm:$0xff] }
  0x8b   : > { %v1112_v56 = vsel %vm1094_vm3, %v1110_v6, %v1111_v52  ;;  %v724_v29 = vmul.f32 %v1921_v40, %v614_v5  ;;  %v932_v47 = vrot.slane %v863_v61, 6  ;;  %v933_v39 = vrot.slane %v2629_v16, 6 }
  0x8c   : > { %v1157_v57 = vadd.f32 %v1112_v56, %v837_v26  ;;  %v695_v1 = vadd.f32 %v671_v8, %v643_v0  ;;  %v696_v31 = vadd.f32 %v672_v53, %v644_v14  ;;  %v963_v58 = vmul.f32 %v1923_v41, %v2340_v9  ;;  %v2861_v26 = vld [vmem:[#allocation10_spill] sm:$0xff] }
  0x8d   : > { %v934_v60 = vsel %vm881_vm1, %v932_v47, %v933_v39  ;;  %v964_v50 = vmul.f32 %v1923_v41, %v2854_v10  ;;  %v991_v13 = vmul.f32 %v1925_v42, %v2855_v12  ;;  %v992_v48 = vmul.f32 %v1925_v42, %v2856_v3  ;;  %v2862_v8 = vld [vmem:[#allocation14_spill] sm:$0xff]  ;;  %v2863_v10 = vld [vmem:[#allocation21_spill] sm:$0xff] }
  0x8e   : > { %1589 = vmatprep.mubr.f32.mxu0 %v1157_v57  ;;  %v747_v27 = vadd.f32 %v723_v23, %v695_v1  ;;  %v748_v21 = vadd.f32 %v724_v29, %v696_v31  ;;  %v1043_v63 = vmul.f32 %v1927_v43, %v932_v47  ;;  %v1044_v20 = vmul.f32 %v1927_v43, %v934_v60  ;;  %v434_v29 = vld [vmem:[%s2591_s7 + $0x8] sm:$0xff] }
  0x8f   : > { %v1015_v2 = vadd.f32 %v991_v13, %v963_v58  ;;  %v1016_v9 = vadd.f32 %v992_v48, %v964_v50  ;;  %v446_v55 = vmul.f32 %v1901_v34, %v2857_v4  ;;  %v466_v51 = vmul.f32 %v1883_v30, %v2858_v19 }
  0x90   : > { %v810_v15 = vrot.slane %v747_v27, 1  ;;  %v811_v32 = vrot.slane %v748_v21, 1  ;;  %v502_v54 = vmul.f32 %v1894_v33, %v2859_v18  ;;  %v633_v0 = vmul.f32 %v1903_v35, %v2860_v25 }
  0x91   : > { %v1067_v14 = vadd.f32 %v1043_v63, %v1015_v2  ;;  %v1068_v61 = vadd.f32 %v1044_v20, %v1016_v9  ;;  %v482_v16 = vadd.f32 %v466_v51, %v446_v55  ;;  %v661_v6 = vmul.f32 %v1905_v36, %v2861_v26 }
  0x92   : > { %v812_v5 = vsel %vm774_vm2, %v810_v15, %v811_v32  ;;  %v713_v53 = vmul.f32 %v1921_v40, %v2862_v8  ;;  %v953_v23 = vmul.f32 %v1923_v41, %v2281_v24  ;;  %v981_v56 = vmul.f32 %v1925_v42, %v2846_v37 }
  0x93   : > { %v845_v47 = vadd.f32 %v812_v5, %v525_v38  ;;  %v1130_v57 = vrot.slane %v1067_v14, 2  ;;  %v1131_v1 = vrot.slane %v1068_v61, 2  ;;  %v518_v31 = vadd.f32 %v502_v54, %v482_v16 }
  0x94   : > { %v685_v58 = vadd.f32 %v661_v6, %v633_v0  ;;  %v1005_v60 = vadd.f32 %v981_v56, %v953_v23  ;;  %v1033_v50 = vmul.f32 %v1927_v43, %v2863_v10  ;;  %v454_v12 = vmul.f32 %v1901_v34, %v2387_v45 }
  0x95   : > { %v1132_v13 = vsel %vm1094_vm3, %v1130_v57, %v1131_v1  ;;  %v474_v24 = vmul.f32 %v1883_v30, %v2539_v49  ;;  %v510_v37 = vmul.f32 %v1894_v33, %v434_v29  ;;  %v645_v38 = vmul.f32 %v1903_v35, %v2315_v44 }
  0x96   : > { %v1165_v3 = vadd.f32 %v1132_v13, %v845_v47  ;;  %v737_v48 = vadd.f32 %v713_v53, %v685_v58  ;;  %v1057_v27 = vadd.f32 %v1033_v50, %v1005_v60  ;;  %v673_v21 = vmul.f32 %v1905_v36, %v2468_v11 }
  0x97   : > { %v490_v63 = vadd.f32 %v474_v24, %v454_v12  ;;  %v725_v34 = vmul.f32 %v1921_v40, %v613_v22  ;;  %v965_v45 = vmul.f32 %v1923_v41, %v2342_v62  ;;  %v993_v30 = vmul.f32 %v1925_v42, %v2497_v17 }
  0x98   : > { %1601 = vmatprep.mubr.f32.mxu1 %v1165_v3  ;;  %v793_v33 = vrot.slane %v737_v48, 1  ;;  %v1113_v35 = vrot.slane %v1057_v27, 2  ;;  %v697_v44 = vadd.f32 %v673_v21, %v645_v38  ;;  %v1045_v49 = vmul.f32 %v1927_v43, %v933_v39 }
  0x99   : > { %v526_v20 = vadd.f32 %v510_v37, %v490_v63  ;;  %v1017_v36 = vadd.f32 %v993_v30, %v965_v45 }
  0x9a   : > { %v794_v11 = vsel %vm774_vm2, %v791_v46, %v793_v33  ;;  %v1114_v40 = vsel %vm1094_vm3, %v1111_v52, %v1113_v35  ;;  %v749_v41 = vadd.f32 %v725_v34, %v697_v44 }
  0x9b   : > { %v838_v62 = vadd.f32 %v794_v11, %v518_v31  ;;  %v1069_v42 = vadd.f32 %v1045_v49, %v1017_v36 }
  0x9c   : > { %v813_v17 = vrot.slane %v749_v41, 1 }
  0x9d   : > { %v1158_v7 = vadd.f32 %v1114_v40, %v838_v62  ;;  %v1133_v22 = vrot.slane %v1069_v42, 2 }
  0x9e   : > { %v814_v2 = vsel %vm774_vm2, %v811_v32, %v813_v17 }
  0x9f   : > { %1590 = vmatmul.mubr.f32.gmra.mrb[6].mxu0 %v1158_v7  ;;  %v846_v43 = vadd.f32 %v814_v2, %v526_v20  ;;  %v1134_v39 = vsel %vm1094_vm3, %v1131_v1, %v1133_v22 }
  0xa1   : > { %v1166_v9 = vadd.f32 %v1134_v39, %v846_v43 }
  0xa3   : > { %1602 = vmatmul.mubr.f32.gmra.mrb[6].mxu1 %v1166_v9 }
 0x11f   : > { %v1582_v28 = vpop.f32.mrb[0].mxu0 }
 0x120   : > { %1329 = vst [vmem:[%s2706_s29 + $0x8] sm:$0xff] %v1582_v28  ;;  %v1249_v46 = vpop.f32.mrb[1].mxu0 }
 0x121   : > { %1328 = vst [vmem:[%s2706_s29] sm:$0xff] %v1249_v46 }
 0x123   : > { %v1594_v59 = vpop.f32.mrb[0].mxu1 }
 0x124   : > { %1337 = vst [vmem:[%s2706_s29 + $0x48] sm:$0xff] %v1594_v59  ;;  %v1289_v52 = vpop.f32.mrb[1].mxu1 }
 0x125   : > { %1336 = vst [vmem:[%s2706_s29 + $0x40] sm:$0xff] %v1289_v52 }
 0x13a   : > { %v1585_v4 = vpop.f32.mrb[2].mxu0 }
 0x13b   : > { %1331 = vst [vmem:[%s2706_s29 + $0x18] sm:$0xff] %v1585_v4  ;;  %v1259_v55 = vpop.f32.mrb[3].mxu0 }
 0x13c   : > { %1330 = vst [vmem:[%s2706_s29 + $0x10] sm:$0xff] %v1259_v55 }
 0x140   : > { %v1597_v19 = vpop.f32.mrb[2].mxu1 }
 0x141   : > { %1339 = vst [vmem:[%s2706_s29 + $0x58] sm:$0xff] %v1597_v19  ;;  %v1299_v51 = vpop.f32.mrb[3].mxu1 }
 0x142   : > { %1338 = vst [vmem:[%s2706_s29 + $0x50] sm:$0xff] %v1299_v51 }
 0x155   : > { %v1588_v15 = vpop.f32.mrb[4].mxu0 }
 0x156   : > { %1333 = vst [vmem:[%s2706_s29 + $0x28] sm:$0xff] %v1588_v15  ;;  %v1269_v32 = vpop.f32.mrb[5].mxu0 }
 0x157   : > { %1332 = vst [vmem:[%s2706_s29 + $0x20] sm:$0xff] %v1269_v32 }
 0x159   : > { %v1600_v18 = vpop.f32.mrb[4].mxu1 }
 0x15a   : > { %1341 = vst [vmem:[%s2706_s29 + $0x68] sm:$0xff] %v1600_v18  ;;  %v1309_v54 = vpop.f32.mrb[5].mxu1 }
 0x15b   : > { %1340 = vst [vmem:[%s2706_s29 + $0x60] sm:$0xff] %v1309_v54 }
 0x172   : > { %v1591_v25 = vpop.f32.mrb[6].mxu0 }
 0x173   : > { %1335 = vst [vmem:[%s2706_s29 + $0x38] sm:$0xff] %v1591_v25  ;;  %v1279_v0 = vpop.f32.mrb[7].mxu0 }
 0x174   : > { %1334 = vst [vmem:[%s2706_s29 + $0x30] sm:$0xff] %v1279_v0 }
 0x176   : > { %v1603_v14 = vpop.f32.mrb[6].mxu1 }
 0x177   : > { %1343 = vst [vmem:[%s2706_s29 + $0x78] sm:$0xff] %v1603_v14  ;;  %v1319_v61 = vpop.f32.mrb[7].mxu1 }
 0x178   : > { %1342 = vst [vmem:[%s2706_s29 + $0x70] sm:$0xff] %v1319_v61 }
 0x179 PF: > { %s15_s22 = sadd.s32 1, %s1734_s22   ;;  %s2864_s18 = smov %s1726_s20 }
 0x17a   : > { %p12_p12 = scmp.ge.s32.totalorder %s15_s22, 6   ;;  %s2865_s19 = smov %s1730_s21 }
 0x17b   : > { %s2866_s20 = smov %s2869_s23  ;;  %s2867_s21 = smov %s2873_s24 }
 0x17c   :  { %14 = sbr.rel (!%p12_p12) target bundleno = 3 (0x3), region = 76 }

</bundles_post_ra>
